<compile_context>
chip_gen: v5e
topology: v5e:2x2
jax: 0.10.0
libtpu: 0.0.40
codegen_flags: <defaults>
</compile_context>

<pallas_src>
import jax
import jax.numpy as jnp
from jax.experimental import pallas as pl
from jax.experimental.pallas import tpu as pltpu

# ---- model hyper-parameters (small, consistent with the module) -------------
BATCH      = 2
EMBED_DIM  = 64
HIDDEN_DIM = 32
MAX_LENGTH = 8
VOCAB_SIZE = 128
LN_EPS     = 1e-5

# ---- packed parameter-slab layout (all row offsets 8-aligned) ---------------
W_SLAB  = 256                       # lane width of the slab (= 8*H)
R_W2    = 0                         # (2H, 8H) fused recurrent weight
R_WP    = 64                        # (E, H)  projection weight
R_VEC   = 128                       # 7 bias/vector rows (see pack_params)
R_WIH0  = 136                       # (H, 4H) layer-0 input weight
R_WO1   = 168                       # (H, 2H) head weight 1
R_WO2   = 200                       # (2H, V) head weight 2
R_TOTAL = 264


# ------------------------------ Pallas kernel --------------------------------
def _text_decoder_kernel(x_ref, slab_ref, out_ref, hs_ref):
    H, T, B = HIDDEN_DIM, MAX_LENGTH, BATCH
    H4, H8 = 4 * H, 8 * H

    # ---- prologue: projection (these reads are dead before the time loop) ---
    wp    = slab_ref[pl.ds(R_WP, EMBED_DIM), pl.ds(0, H)]
    bp    = slab_ref[pl.ds(R_VEC + 0, 1), pl.ds(0, H)]
    gamma = slab_ref[pl.ds(R_VEC + 1, 1), pl.ds(0, H)]
    beta  = slab_ref[pl.ds(R_VEC + 2, 1), pl.ds(0, H)]
    wih0  = slab_ref[pl.ds(R_WIH0, H), pl.ds(0, H4)]
    b0    = slab_ref[pl.ds(R_VEC + 3, 1), pl.ds(0, H4)]

    x = x_ref[...].astype(jnp.float32)
    h = jnp.dot(x, wp, preferred_element_type=jnp.float32) + bp
    mean = jnp.mean(h, axis=-1, keepdims=True)
    var = jnp.mean((h - mean) ** 2, axis=-1, keepdims=True)
    h = (h - mean) * jax.lax.rsqrt(var + LN_EPS)
    h = h * gamma + beta
    h = jnp.maximum(h, 0.0)                                        # (B, H)

    # Input is time-invariant -> layer-0 input-gate contribution computed once.
    gx0 = jnp.dot(h, wih0, preferred_element_type=jnp.float32) + b0  # (B, 4H)

    # ---- loop-invariant values that stay live across the recurrence ---------
    # Fused recurrent weight, cast to bf16 once (single-pass MXU per step).
    w2 = slab_ref[pl.ds(R_W2, 2 * H), pl.ds(0, H8)].astype(jnp.bfloat16)
    b1 = slab_ref[pl.ds(R_VEC + 4, 1), pl.ds(0, H4)]                 # (1, 4H)
    # g-gate lanes get a factor 2 so tanh(g) = 2*sigmoid(2g) - 1 (1 EUP push).
    lane = jax.lax.broadcasted_iota(jnp.int32, (1, H4), 1)
    gsc = jnp.where((lane >= 2 * H) & (lane < 3 * H), 2.0, 1.0).astype(jnp.float32)

    zs = jnp.zeros((B, H), jnp.float32)
    h0, c0, h1, c1 = zs, zs, zs, zs
    rec0 = jnp.zeros((B, H4), jnp.float32)        # = h0_{t-1} @ whh0 (0 at t=0)

    # Static (unrolled) time loop — only the two LSTM layers live here.
    for t in range(T):
        # ----- LSTM layer 0 (gates i, f, g, o) -----
        g0 = gx0 + rec0
        s0 = jax.nn.sigmoid(g0 * gsc)             # one full-width sigmoid
        i0, f0, o0 = s0[:, 0:H], s0[:, H:2 * H], s0[:, 3 * H:H4]
        gc0 = 2.0 * s0[:, 2 * H:3 * H] - 1.0      # = tanh(g-gate)
        c0 = f0 * c0 + i0 * gc0
        h0 = o0 * jnp.tanh(c0)

        # ----- fused recurrent matmul: [h0_t, h1_{t-1}] @ W2 (one MXU push) --
        hcat = jnp.concatenate([h0, h1], axis=-1).astype(jnp.bfloat16)  # (B,2H)
        m = jnp.dot(hcat, w2, preferred_element_type=jnp.float32)       # (B,8H)
        rec0 = m[:, 0:H4]                         # layer-0 recurrence, step t+1
        g1 = m[:, H4:H8] + b1                     # layer-1 gates, step t

        # ----- LSTM layer 1 -----
        s1 = jax.nn.sigmoid(g1 * gsc)
        i1, f1, o1 = s1[:, 0:H], s1[:, H:2 * H], s1[:, 3 * H:H4]
        gc1 = 2.0 * s1[:, 2 * H:3 * H] - 1.0
        c1 = f1 * c1 + i1 * gc1
        h1 = o1 * jnp.tanh(c1)

        # batch-major writeback to VMEM scratch (off the critical path)
        for b in range(B):
            hs_ref[pl.ds(b * T + t, 1), pl.ds(0, H)] = h1[b:b + 1, :]

    # ----- deferred output head over the whole (B*T, H) slab -----------------
    hs  = hs_ref[...]
    wo1 = slab_ref[pl.ds(R_WO1, H), pl.ds(0, 2 * H)]
    bo1 = slab_ref[pl.ds(R_VEC + 5, 1), pl.ds(0, 2 * H)]
    wo2 = slab_ref[pl.ds(R_WO2, 2 * H), pl.ds(0, VOCAB_SIZE)]
    bo2 = slab_ref[pl.ds(R_VEC + 6, 1), pl.ds(0, VOCAB_SIZE)]
    mid = jnp.maximum(
        jnp.dot(hs, wo1, preferred_element_type=jnp.float32) + bo1, 0.0)
    logits = jnp.dot(mid, wo2, preferred_element_type=jnp.float32) + bo2
    out_ref[...] = logits.astype(out_ref.dtype)   # single lane-dense store


# --------------------------- parameter packing --------------------------------
def pack_params(params):
    """Pack all weights/biases into one (R_TOTAL, 256) f32 slab (done once)."""
    (wp, bp, gamma, beta,
     wih0, whh0, b0,
     wih1, whh1, b1,
     wo1, bo1, wo2, bo2) = params
    H = HIDDEN_DIM

    # Fused recurrent weight: [[whh0, wih1], [0, whh1]]  -> (2H, 8H)
    w2 = jnp.concatenate([
        jnp.concatenate([whh0, wih1], axis=1),
        jnp.concatenate([jnp.zeros_like(whh1), whh1], axis=1)], axis=0)

    slab = jnp.zeros((R_TOTAL, W_SLAB), jnp.float32)
    slab = slab.at[R_W2:R_W2 + 2 * H, :].set(w2)
    slab = slab.at[R_WP:R_WP + EMBED_DIM, :H].set(wp)
    slab = slab.at[R_VEC + 0, :H].set(bp)
    slab = slab.at[R_VEC + 1, :H].set(gamma)
    slab = slab.at[R_VEC + 2, :H].set(beta)
    slab = slab.at[R_VEC + 3, :4 * H].set(b0)
    slab = slab.at[R_VEC + 4, :4 * H].set(b1)
    slab = slab.at[R_VEC + 5, :2 * H].set(bo1)
    slab = slab.at[R_VEC + 6, :VOCAB_SIZE].set(bo2)
    slab = slab.at[R_WIH0:R_WIH0 + H, :4 * H].set(wih0)
    slab = slab.at[R_WO1:R_WO1 + H, :2 * H].set(wo1)
    slab = slab.at[R_WO2:R_WO2 + 2 * H, :VOCAB_SIZE].set(wo2)
    return slab


# ------------------------------ wrapper ---------------------------------------
@jax.jit
def text_decoder_forward(x, slab):
    """x: (B, EMBED_DIM) f32, slab: packed params -> (B, MAX_LENGTH, VOCAB)."""
    vmem = pl.BlockSpec(memory_space=pltpu.MemorySpace.VMEM)
    flat = pl.pallas_call(
        _text_decoder_kernel,
        out_shape=jax.ShapeDtypeStruct((BATCH * MAX_LENGTH, VOCAB_SIZE),
                                       jnp.float32),
        in_specs=[vmem, vmem],
        out_specs=vmem,
        scratch_shapes=[pltpu.VMEM((BATCH * MAX_LENGTH, HIDDEN_DIM),
                                   jnp.float32)],
    )(x, slab)
    # Batch-major slab -> free reshape (no transpose, no extra HBM round-trip).
    return flat.reshape(BATCH, MAX_LENGTH, VOCAB_SIZE)


# -------------------------- parameter construction ---------------------------
def init_params(key):
    H, E, V = HIDDEN_DIM, EMBED_DIM, VOCAB_SIZE
    ks = jax.random.split(key, 16)
    scale = 0.1

    def rnd(k, shape):
        return scale * jax.random.normal(k, shape, dtype=jnp.float32)

    # projection Linear (stored transposed: (in, out))
    wp = rnd(ks[0], (E, H))
    bp = rnd(ks[1], (H,))
    gamma = jnp.ones((H,), jnp.float32)
    beta = jnp.zeros((H,), jnp.float32)

    # LSTM layer 0: torch weight_ih/_hh (4H, H) stored transposed as (H, 4H)
    wih0 = rnd(ks[2], (H, 4 * H))
    whh0 = rnd(ks[3], (H, 4 * H))
    b0 = rnd(ks[4], (4 * H,)) + rnd(ks[5], (4 * H,))   # b_ih + b_hh combined

    # LSTM layer 1
    wih1 = rnd(ks[6], (H, 4 * H))
    whh1 = rnd(ks[7], (H, 4 * H))
    b1 = rnd(ks[8], (4 * H,)) + rnd(ks[9], (4 * H,))

    # output head
    wo1 = rnd(ks[10], (H, 2 * H))
    bo1 = rnd(ks[11], (2 * H,))
    wo2 = rnd(ks[12], (2 * H, V))
    bo2 = rnd(ks[13], (V,))

    return (wp, bp, gamma, beta,
            wih0, whh0, b0,
            wih1, whh1, b1,
            wo1, bo1, wo2, bo2)


# ---------------------------- pure-JAX reference ------------------------------
def reference_forward(x, params):
    (wp, bp, gamma, beta,
     wih0, whh0, b0,
     wih1, whh1, b1,
     wo1, bo1, wo2, bo2) = params
    H = HIDDEN_DIM

    h = x @ wp + bp
    mean = jnp.mean(h, axis=-1, keepdims=True)
    var = jnp.mean((h - mean) ** 2, axis=-1, keepdims=True)
    h = (h - mean) / jnp.sqrt(var + LN_EPS) * gamma + beta
    h = jnp.maximum(h, 0.0)

    gx0 = h @ wih0 + b0
    h0 = jnp.zeros_like(h); c0 = jnp.zeros_like(h)
    h1 = jnp.zeros_like(h); c1 = jnp.zeros_like(h)
    outs = []
    for _ in range(MAX_LENGTH):
        g0 = gx0 + h0 @ whh0
        i0, f0, gc0, o0 = (jax.nn.sigmoid(g0[:, :H]), jax.nn.sigmoid(g0[:, H:2*H]),
                           jnp.tanh(g0[:, 2*H:3*H]), jax.nn.sigmoid(g0[:, 3*H:]))
        c0 = f0 * c0 + i0 * gc0
        h0 = o0 * jnp.tanh(c0)
        g1 = h0 @ wih1 + h1 @ whh1 + b1
        i1, f1, gc1, o1 = (jax.nn.sigmoid(g1[:, :H]), jax.nn.sigmoid(g1[:, H:2*H]),
                           jnp.tanh(g1[:, 2*H:3*H]), jax.nn.sigmoid(g1[:, 3*H:]))
        c1 = f1 * c1 + i1 * gc1
        h1 = o1 * jnp.tanh(c1)
        mid = jnp.maximum(h1 @ wo1 + bo1, 0.0)
        outs.append(mid @ wo2 + bo2)
    return jnp.stack(outs, axis=1)


# ----------------------------------- main -------------------------------------
if __name__ == "__main__":
    key = jax.random.PRNGKey(0)
    k_x, k_p = jax.random.split(key)
    x = jax.random.normal(k_x, (BATCH, EMBED_DIM), dtype=jnp.float32)
    params = init_params(k_p)
    slab = pack_params(params)          # one-time parameter packing

    logits = jax.block_until_ready(text_decoder_forward(x, slab))
    ref = jax.block_until_ready(reference_forward(x, params))

    assert logits.shape == (BATCH, MAX_LENGTH, VOCAB_SIZE), logits.shape
    # Tolerance loosened slightly: the recurrent matmuls use bf16 MXU inputs
    # (f32 accumulation); the reference is pure f32.
    assert jnp.allclose(logits, ref, rtol=5e-3, atol=5e-3), (
        float(jnp.max(jnp.abs(logits - ref))))

    print("KERNEL_OK")
</pallas_src>

<mosaic_0001>
module attributes {stable_mosaic.version = 11 : i64} {
  func.func @_text_decoder_kernel(%arg0: memref<2x64xf32, #tpu.memory_space<vmem>>, %arg1: memref<264x256xf32, #tpu.memory_space<vmem>>, %arg2: memref<16x128xf32, #tpu.memory_space<vmem>>, %arg3: memref<16x32xf32, #tpu.memory_space<vmem>>) attributes {dimension_semantics = [], scalar_prefetch = 0 : i64, scratch_operands = 1 : i64, tpu.core_type = #tpu.core_type<tc>} {
    %c64 = arith.constant 64 : index
    %c0 = arith.constant 0 : index
    %0 = vector.load %arg1[%c64, %c0] : memref<264x256xf32, #tpu.memory_space<vmem>>, vector<64x32xf32>
    %c128 = arith.constant 128 : index
    %c0_0 = arith.constant 0 : index
    %1 = vector.load %arg1[%c128, %c0_0] : memref<264x256xf32, #tpu.memory_space<vmem>>, vector<1x32xf32>
    %c129 = arith.constant 129 : index
    %c0_1 = arith.constant 0 : index
    %2 = vector.load %arg1[%c129, %c0_1] : memref<264x256xf32, #tpu.memory_space<vmem>>, vector<1x32xf32>
    %c130 = arith.constant 130 : index
    %c0_2 = arith.constant 0 : index
    %3 = vector.load %arg1[%c130, %c0_2] : memref<264x256xf32, #tpu.memory_space<vmem>>, vector<1x32xf32>
    %c136 = arith.constant 136 : index
    %c0_3 = arith.constant 0 : index
    %4 = vector.load %arg1[%c136, %c0_3] : memref<264x256xf32, #tpu.memory_space<vmem>>, vector<32x128xf32>
    %c131 = arith.constant 131 : index
    %c0_4 = arith.constant 0 : index
    %5 = vector.load %arg1[%c131, %c0_4] : memref<264x256xf32, #tpu.memory_space<vmem>>, vector<1x128xf32>
    %c0_5 = arith.constant 0 : index
    %c0_6 = arith.constant 0 : index
    %6 = vector.load %arg0[%c0_5, %c0_6] : memref<2x64xf32, #tpu.memory_space<vmem>>, vector<2x64xf32>
    %cst = arith.constant dense<0.000000e+00> : vector<2x32xf32>
    %7 = tpu.matmul %6, %0, %cst {dimension_numbers = #tpu.dot_dimension_numbers<[1], [0], [0], [1], [0, 0, 1, 1], [], []>} : vector<2x64xf32>, vector<64x32xf32>, vector<2x32xf32> -> vector<2x32xf32>
    %8 = vector.broadcast %1 : vector<1x32xf32> to vector<2x32xf32>
    %9 = arith.addf %7, %8 : vector<2x32xf32>
    %cst_7 = arith.constant dense<0.000000e+00> : vector<2xf32>
    %10 = vector.multi_reduction <add>, %9, %cst_7 [1] : vector<2x32xf32> to vector<2xf32>
    %11 = vector.shape_cast %10 : vector<2xf32> to vector<2x1xf32>
    %cst_8 = arith.constant 3.200000e+01 : f32
    %12 = vector.broadcast %cst_8 : f32 to vector<2x1xf32>
    %13 = arith.divf %11, %12 : vector<2x1xf32>
    %14 = vector.broadcast %13 : vector<2x1xf32> to vector<2x32xf32>
    %15 = arith.subf %9, %14 : vector<2x32xf32>
    %16 = arith.mulf %15, %15 : vector<2x32xf32>
    %cst_9 = arith.constant dense<0.000000e+00> : vector<2xf32>
    %17 = vector.multi_reduction <add>, %16, %cst_9 [1] : vector<2x32xf32> to vector<2xf32>
    %18 = vector.shape_cast %17 : vector<2xf32> to vector<2x1xf32>
    %cst_10 = arith.constant 3.200000e+01 : f32
    %19 = vector.broadcast %cst_10 : f32 to vector<2x1xf32>
    %20 = arith.divf %18, %19 : vector<2x1xf32>
    %21 = vector.broadcast %13 : vector<2x1xf32> to vector<2x32xf32>
    %22 = arith.subf %9, %21 : vector<2x32xf32>
    %cst_11 = arith.constant 9.99999974E-6 : f32
    %23 = vector.broadcast %cst_11 : f32 to vector<2x1xf32>
    %24 = arith.addf %20, %23 : vector<2x1xf32>
    %25 = math.rsqrt %24 : vector<2x1xf32>
    %26 = vector.broadcast %25 : vector<2x1xf32> to vector<2x32xf32>
    %27 = arith.mulf %22, %26 : vector<2x32xf32>
    %28 = vector.broadcast %2 : vector<1x32xf32> to vector<2x32xf32>
    %29 = arith.mulf %27, %28 : vector<2x32xf32>
    %30 = vector.broadcast %3 : vector<1x32xf32> to vector<2x32xf32>
    %31 = arith.addf %29, %30 : vector<2x32xf32>
    %cst_12 = arith.constant 0.000000e+00 : f32
    %32 = vector.broadcast %cst_12 : f32 to vector<2x32xf32>
    %33 = arith.maximumf %31, %32 : vector<2x32xf32>
    %cst_13 = arith.constant dense<0.000000e+00> : vector<2x128xf32>
    %34 = tpu.matmul %33, %4, %cst_13 {dimension_numbers = #tpu.dot_dimension_numbers<[1], [0], [0], [1], [0, 0, 1, 1], [], []>} : vector<2x32xf32>, vector<32x128xf32>, vector<2x128xf32> -> vector<2x128xf32>
    %35 = vector.broadcast %5 : vector<1x128xf32> to vector<2x128xf32>
    %36 = arith.addf %34, %35 : vector<2x128xf32>
    %c0_14 = arith.constant 0 : index
    %c0_15 = arith.constant 0 : index
    %37 = vector.load %arg1[%c0_14, %c0_15] : memref<264x256xf32, #tpu.memory_space<vmem>>, vector<64x256xf32>
    %38 = arith.truncf %37 : vector<64x256xf32> to vector<64x256xbf16>
    %c132 = arith.constant 132 : index
    %c0_16 = arith.constant 0 : index
    %39 = vector.load %arg1[%c132, %c0_16] : memref<264x256xf32, #tpu.memory_space<vmem>>, vector<1x128xf32>
    %40 = tpu.iota {dimensions = array<i32: 1>} : vector<1x128xi32>
    %c64_i32 = arith.constant 64 : i32
    %41 = vector.broadcast %c64_i32 : i32 to vector<1x128xi32>
    %42 = arith.cmpi sge, %40, %41 : vector<1x128xi32>
    %c96_i32 = arith.constant 96 : i32
    %43 = vector.broadcast %c96_i32 : i32 to vector<1x128xi32>
    %44 = arith.cmpi slt, %40, %43 : vector<1x128xi32>
    %45 = arith.andi %42, %44 : vector<1x128xi1>
    %cst_17 = arith.constant 2.000000e+00 : f32
    %cst_18 = arith.constant 1.000000e+00 : f32
    %46 = vector.broadcast %cst_17 : f32 to vector<1x128xf32>
    %47 = vector.broadcast %cst_18 : f32 to vector<1x128xf32>
    %48 = arith.select %45, %46, %47 : vector<1x128xi1>, vector<1x128xf32>
    %cst_19 = arith.constant 0.000000e+00 : f32
    %49 = vector.broadcast %cst_19 : f32 to vector<2x32xf32>
    %cst_20 = arith.constant 0.000000e+00 : f32
    %50 = vector.broadcast %cst_20 : f32 to vector<2x128xf32>
    %51 = arith.addf %36, %50 : vector<2x128xf32>
    %52 = vector.broadcast %48 : vector<1x128xf32> to vector<2x128xf32>
    %53 = arith.mulf %51, %52 : vector<2x128xf32>
    %54 = arith.negf %53 : vector<2x128xf32>
    %55 = math.exp %54 : vector<2x128xf32>
    %cst_21 = arith.constant 1.000000e+00 : f32
    %56 = vector.broadcast %cst_21 : f32 to vector<2x128xf32>
    %57 = arith.addf %56, %55 : vector<2x128xf32>
    %58 = arith.divf %56, %57 : vector<2x128xf32>
    %59 = vector.extract_strided_slice %58 {offsets = [0, 0], sizes = [2, 32], strides = [1, 1]} : vector<2x128xf32> to vector<2x32xf32>
    %60 = vector.extract_strided_slice %58 {offsets = [0, 32], sizes = [2, 32], strides = [1, 1]} : vector<2x128xf32> to vector<2x32xf32>
    %61 = vector.extract_strided_slice %58 {offsets = [0, 96], sizes = [2, 32], strides = [1, 1]} : vector<2x128xf32> to vector<2x32xf32>
    %62 = vector.extract_strided_slice %58 {offsets = [0, 64], sizes = [2, 32], strides = [1, 1]} : vector<2x128xf32> to vector<2x32xf32>
    %cst_22 = arith.constant 2.000000e+00 : f32
    %63 = vector.broadcast %cst_22 : f32 to vector<2x32xf32>
    %64 = arith.mulf %63, %62 : vector<2x32xf32>
    %cst_23 = arith.constant 1.000000e+00 : f32
    %65 = vector.broadcast %cst_23 : f32 to vector<2x32xf32>
    %66 = arith.subf %64, %65 : vector<2x32xf32>
    %67 = arith.mulf %60, %49 : vector<2x32xf32>
    %68 = arith.mulf %59, %66 : vector<2x32xf32>
    %69 = arith.addf %67, %68 : vector<2x32xf32>
    %70 = math.tanh %69 : vector<2x32xf32>
    %71 = arith.mulf %61, %70 : vector<2x32xf32>
    %72 = tpu.concatenate %71, %49 in 1 : vector<2x32xf32>, vector<2x32xf32> -> vector<2x64xf32>
    %73 = arith.truncf %72 : vector<2x64xf32> to vector<2x64xbf16>
    %cst_24 = arith.constant dense<0.000000e+00> : vector<2x256xf32>
    %74 = tpu.matmul %73, %38, %cst_24 {dimension_numbers = #tpu.dot_dimension_numbers<[1], [0], [0], [1], [0, 0, 1, 1], [], []>} : vector<2x64xbf16>, vector<64x256xbf16>, vector<2x256xf32> -> vector<2x256xf32>
    %75 = vector.extract_strided_slice %74 {offsets = [0, 0], sizes = [2, 128], strides = [1, 1]} : vector<2x256xf32> to vector<2x128xf32>
    %76 = vector.extract_strided_slice %74 {offsets = [0, 128], sizes = [2, 128], strides = [1, 1]} : vector<2x256xf32> to vector<2x128xf32>
    %77 = vector.broadcast %39 : vector<1x128xf32> to vector<2x128xf32>
    %78 = arith.addf %76, %77 : vector<2x128xf32>
    %79 = vector.broadcast %48 : vector<1x128xf32> to vector<2x128xf32>
    %80 = arith.mulf %78, %79 : vector<2x128xf32>
    %81 = arith.negf %80 : vector<2x128xf32>
    %82 = math.exp %81 : vector<2x128xf32>
    %cst_25 = arith.constant 1.000000e+00 : f32
    %83 = vector.broadcast %cst_25 : f32 to vector<2x128xf32>
    %84 = arith.addf %83, %82 : vector<2x128xf32>
    %85 = arith.divf %83, %84 : vector<2x128xf32>
    %86 = vector.extract_strided_slice %85 {offsets = [0, 0], sizes = [2, 32], strides = [1, 1]} : vector<2x128xf32> to vector<2x32xf32>
    %87 = vector.extract_strided_slice %85 {offsets = [0, 32], sizes = [2, 32], strides = [1, 1]} : vector<2x128xf32> to vector<2x32xf32>
    %88 = vector.extract_strided_slice %85 {offsets = [0, 96], sizes = [2, 32], strides = [1, 1]} : vector<2x128xf32> to vector<2x32xf32>
    %89 = vector.extract_strided_slice %85 {offsets = [0, 64], sizes = [2, 32], strides = [1, 1]} : vector<2x128xf32> to vector<2x32xf32>
    %cst_26 = arith.constant 2.000000e+00 : f32
    %90 = vector.broadcast %cst_26 : f32 to vector<2x32xf32>
    %91 = arith.mulf %90, %89 : vector<2x32xf32>
    %cst_27 = arith.constant 1.000000e+00 : f32
    %92 = vector.broadcast %cst_27 : f32 to vector<2x32xf32>
    %93 = arith.subf %91, %92 : vector<2x32xf32>
    %94 = arith.mulf %87, %49 : vector<2x32xf32>
    %95 = arith.mulf %86, %93 : vector<2x32xf32>
    %96 = arith.addf %94, %95 : vector<2x32xf32>
    %97 = math.tanh %96 : vector<2x32xf32>
    %98 = arith.mulf %88, %97 : vector<2x32xf32>
    %99 = vector.extract_strided_slice %98 {offsets = [0, 0], sizes = [1, 32], strides = [1, 1]} : vector<2x32xf32> to vector<1x32xf32>
    %c0_28 = arith.constant 0 : index
    %c0_29 = arith.constant 0 : index
    %100 = vector.load %arg3[%c0_28, %c0_29] : memref<16x32xf32, #tpu.memory_space<vmem>>, vector<1x32xf32>
    tpu.vector_store %arg3[%c0_28, %c0_29], %99 {strides = array<i32>} : memref<16x32xf32, #tpu.memory_space<vmem>>, vector<1x32xf32>,
    %101 = vector.extract_strided_slice %98 {offsets = [1, 0], sizes = [1, 32], strides = [1, 1]} : vector<2x32xf32> to vector<1x32xf32>
    %c8 = arith.constant 8 : index
    %c0_30 = arith.constant 0 : index
    %102 = vector.load %arg3[%c8, %c0_30] : memref<16x32xf32, #tpu.memory_space<vmem>>, vector<1x32xf32>
    tpu.vector_store %arg3[%c8, %c0_30], %101 {strides = array<i32>} : memref<16x32xf32, #tpu.memory_space<vmem>>, vector<1x32xf32>,
    %103 = arith.addf %36, %75 : vector<2x128xf32>
    %104 = vector.broadcast %48 : vector<1x128xf32> to vector<2x128xf32>
    %105 = arith.mulf %103, %104 : vector<2x128xf32>
    %106 = arith.negf %105 : vector<2x128xf32>
    %107 = math.exp %106 : vector<2x128xf32>
    %cst_31 = arith.constant 1.000000e+00 : f32
    %108 = vector.broadcast %cst_31 : f32 to vector<2x128xf32>
    %109 = arith.addf %108, %107 : vector<2x128xf32>
    %110 = arith.divf %108, %109 : vector<2x128xf32>
    %111 = vector.extract_strided_slice %110 {offsets = [0, 0], sizes = [2, 32], strides = [1, 1]} : vector<2x128xf32> to vector<2x32xf32>
    %112 = vector.extract_strided_slice %110 {offsets = [0, 32], sizes = [2, 32], strides = [1, 1]} : vector<2x128xf32> to vector<2x32xf32>
    %113 = vector.extract_strided_slice %110 {offsets = [0, 96], sizes = [2, 32], strides = [1, 1]} : vector<2x128xf32> to vector<2x32xf32>
    %114 = vector.extract_strided_slice %110 {offsets = [0, 64], sizes = [2, 32], strides = [1, 1]} : vector<2x128xf32> to vector<2x32xf32>
    %cst_32 = arith.constant 2.000000e+00 : f32
    %115 = vector.broadcast %cst_32 : f32 to vector<2x32xf32>
    %116 = arith.mulf %115, %114 : vector<2x32xf32>
    %cst_33 = arith.constant 1.000000e+00 : f32
    %117 = vector.broadcast %cst_33 : f32 to vector<2x32xf32>
    %118 = arith.subf %116, %117 : vector<2x32xf32>
    %119 = arith.mulf %112, %69 : vector<2x32xf32>
    %120 = arith.mulf %111, %118 : vector<2x32xf32>
    %121 = arith.addf %119, %120 : vector<2x32xf32>
    %122 = math.tanh %121 : vector<2x32xf32>
    %123 = arith.mulf %113, %122 : vector<2x32xf32>
    %124 = tpu.concatenate %123, %98 in 1 : vector<2x32xf32>, vector<2x32xf32> -> vector<2x64xf32>
    %125 = arith.truncf %124 : vector<2x64xf32> to vector<2x64xbf16>
    %cst_34 = arith.constant dense<0.000000e+00> : vector<2x256xf32>
    %126 = tpu.matmul %125, %38, %cst_34 {dimension_numbers = #tpu.dot_dimension_numbers<[1], [0], [0], [1], [0, 0, 1, 1], [], []>} : vector<2x64xbf16>, vector<64x256xbf16>, vector<2x256xf32> -> vector<2x256xf32>
    %127 = vector.extract_strided_slice %126 {offsets = [0, 0], sizes = [2, 128], strides = [1, 1]} : vector<2x256xf32> to vector<2x128xf32>
    %128 = vector.extract_strided_slice %126 {offsets = [0, 128], sizes = [2, 128], strides = [1, 1]} : vector<2x256xf32> to vector<2x128xf32>
    %129 = vector.broadcast %39 : vector<1x128xf32> to vector<2x128xf32>
    %130 = arith.addf %128, %129 : vector<2x128xf32>
    %131 = vector.broadcast %48 : vector<1x128xf32> to vector<2x128xf32>
    %132 = arith.mulf %130, %131 : vector<2x128xf32>
    %133 = arith.negf %132 : vector<2x128xf32>
    %134 = math.exp %133 : vector<2x128xf32>
    %cst_35 = arith.constant 1.000000e+00 : f32
    %135 = vector.broadcast %cst_35 : f32 to vector<2x128xf32>
    %136 = arith.addf %135, %134 : vector<2x128xf32>
    %137 = arith.divf %135, %136 : vector<2x128xf32>
    %138 = vector.extract_strided_slice %137 {offsets = [0, 0], sizes = [2, 32], strides = [1, 1]} : vector<2x128xf32> to vector<2x32xf32>
    %139 = vector.extract_strided_slice %137 {offsets = [0, 32], sizes = [2, 32], strides = [1, 1]} : vector<2x128xf32> to vector<2x32xf32>
    %140 = vector.extract_strided_slice %137 {offsets = [0, 96], sizes = [2, 32], strides = [1, 1]} : vector<2x128xf32> to vector<2x32xf32>
    %141 = vector.extract_strided_slice %137 {offsets = [0, 64], sizes = [2, 32], strides = [1, 1]} : vector<2x128xf32> to vector<2x32xf32>
    %cst_36 = arith.constant 2.000000e+00 : f32
    %142 = vector.broadcast %cst_36 : f32 to vector<2x32xf32>
    %143 = arith.mulf %142, %141 : vector<2x32xf32>
    %cst_37 = arith.constant 1.000000e+00 : f32
    %144 = vector.broadcast %cst_37 : f32 to vector<2x32xf32>
    %145 = arith.subf %143, %144 : vector<2x32xf32>
    %146 = arith.mulf %139, %96 : vector<2x32xf32>
    %147 = arith.mulf %138, %145 : vector<2x32xf32>
    %148 = arith.addf %146, %147 : vector<2x32xf32>
    %149 = math.tanh %148 : vector<2x32xf32>
    %150 = arith.mulf %140, %149 : vector<2x32xf32>
    %151 = vector.extract_strided_slice %150 {offsets = [0, 0], sizes = [1, 32], strides = [1, 1]} : vector<2x32xf32> to vector<1x32xf32>
    %c1 = arith.constant 1 : index
    %c0_38 = arith.constant 0 : index
    %152 = vector.load %arg3[%c1, %c0_38] : memref<16x32xf32, #tpu.memory_space<vmem>>, vector<1x32xf32>
    tpu.vector_store %arg3[%c1, %c0_38], %151 {strides = array<i32>} : memref<16x32xf32, #tpu.memory_space<vmem>>, vector<1x32xf32>,
    %153 = vector.extract_strided_slice %150 {offsets = [1, 0], sizes = [1, 32], strides = [1, 1]} : vector<2x32xf32> to vector<1x32xf32>
    %c9 = arith.constant 9 : index
    %c0_39 = arith.constant 0 : index
    %154 = vector.load %arg3[%c9, %c0_39] : memref<16x32xf32, #tpu.memory_space<vmem>>, vector<1x32xf32>
    tpu.vector_store %arg3[%c9, %c0_39], %153 {strides = array<i32>} : memref<16x32xf32, #tpu.memory_space<vmem>>, vector<1x32xf32>,
    %155 = arith.addf %36, %127 : vector<2x128xf32>
    %156 = vector.broadcast %48 : vector<1x128xf32> to vector<2x128xf32>
    %157 = arith.mulf %155, %156 : vector<2x128xf32>
    %158 = arith.negf %157 : vector<2x128xf32>
    %159 = math.exp %158 : vector<2x128xf32>
    %cst_40 = arith.constant 1.000000e+00 : f32
    %160 = vector.broadcast %cst_40 : f32 to vector<2x128xf32>
    %161 = arith.addf %160, %159 : vector<2x128xf32>
    %162 = arith.divf %160, %161 : vector<2x128xf32>
    %163 = vector.extract_strided_slice %162 {offsets = [0, 0], sizes = [2, 32], strides = [1, 1]} : vector<2x128xf32> to vector<2x32xf32>
    %164 = vector.extract_strided_slice %162 {offsets = [0, 32], sizes = [2, 32], strides = [1, 1]} : vector<2x128xf32> to vector<2x32xf32>
    %165 = vector.extract_strided_slice %162 {offsets = [0, 96], sizes = [2, 32], strides = [1, 1]} : vector<2x128xf32> to vector<2x32xf32>
    %166 = vector.extract_strided_slice %162 {offsets = [0, 64], sizes = [2, 32], strides = [1, 1]} : vector<2x128xf32> to vector<2x32xf32>
    %cst_41 = arith.constant 2.000000e+00 : f32
    %167 = vector.broadcast %cst_41 : f32 to vector<2x32xf32>
    %168 = arith.mulf %167, %166 : vector<2x32xf32>
    %cst_42 = arith.constant 1.000000e+00 : f32
    %169 = vector.broadcast %cst_42 : f32 to vector<2x32xf32>
    %170 = arith.subf %168, %169 : vector<2x32xf32>
    %171 = arith.mulf %164, %121 : vector<2x32xf32>
    %172 = arith.mulf %163, %170 : vector<2x32xf32>
    %173 = arith.addf %171, %172 : vector<2x32xf32>
    %174 = math.tanh %173 : vector<2x32xf32>
    %175 = arith.mulf %165, %174 : vector<2x32xf32>
    %176 = tpu.concatenate %175, %150 in 1 : vector<2x32xf32>, vector<2x32xf32> -> vector<2x64xf32>
    %177 = arith.truncf %176 : vector<2x64xf32> to vector<2x64xbf16>
    %cst_43 = arith.constant dense<0.000000e+00> : vector<2x256xf32>
    %178 = tpu.matmul %177, %38, %cst_43 {dimension_numbers = #tpu.dot_dimension_numbers<[1], [0], [0], [1], [0, 0, 1, 1], [], []>} : vector<2x64xbf16>, vector<64x256xbf16>, vector<2x256xf32> -> vector<2x256xf32>
    %179 = vector.extract_strided_slice %178 {offsets = [0, 0], sizes = [2, 128], strides = [1, 1]} : vector<2x256xf32> to vector<2x128xf32>
    %180 = vector.extract_strided_slice %178 {offsets = [0, 128], sizes = [2, 128], strides = [1, 1]} : vector<2x256xf32> to vector<2x128xf32>
    %181 = vector.broadcast %39 : vector<1x128xf32> to vector<2x128xf32>
    %182 = arith.addf %180, %181 : vector<2x128xf32>
    %183 = vector.broadcast %48 : vector<1x128xf32> to vector<2x128xf32>
    %184 = arith.mulf %182, %183 : vector<2x128xf32>
    %185 = arith.negf %184 : vector<2x128xf32>
    %186 = math.exp %185 : vector<2x128xf32>
    %cst_44 = arith.constant 1.000000e+00 : f32
    %187 = vector.broadcast %cst_44 : f32 to vector<2x128xf32>
    %188 = arith.addf %187, %186 : vector<2x128xf32>
    %189 = arith.divf %187, %188 : vector<2x128xf32>
    %190 = vector.extract_strided_slice %189 {offsets = [0, 0], sizes = [2, 32], strides = [1, 1]} : vector<2x128xf32> to vector<2x32xf32>
    %191 = vector.extract_strided_slice %189 {offsets = [0, 32], sizes = [2, 32], strides = [1, 1]} : vector<2x128xf32> to vector<2x32xf32>
    %192 = vector.extract_strided_slice %189 {offsets = [0, 96], sizes = [2, 32], strides = [1, 1]} : vector<2x128xf32> to vector<2x32xf32>
    %193 = vector.extract_strided_slice %189 {offsets = [0, 64], sizes = [2, 32], strides = [1, 1]} : vector<2x128xf32> to vector<2x32xf32>
    %cst_45 = arith.constant 2.000000e+00 : f32
    %194 = vector.broadcast %cst_45 : f32 to vector<2x32xf32>
    %195 = arith.mulf %194, %193 : vector<2x32xf32>
    %cst_46 = arith.constant 1.000000e+00 : f32
    %196 = vector.broadcast %cst_46 : f32 to vector<2x32xf32>
    %197 = arith.subf %195, %196 : vector<2x32xf32>
    %198 = arith.mulf %191, %148 : vector<2x32xf32>
    %199 = arith.mulf %190, %197 : vector<2x32xf32>
    %200 = arith.addf %198, %199 : vector<2x32xf32>
    %201 = math.tanh %200 : vector<2x32xf32>
    %202 = arith.mulf %192, %201 : vector<2x32xf32>
    %203 = vector.extract_strided_slice %202 {offsets = [0, 0], sizes = [1, 32], strides = [1, 1]} : vector<2x32xf32> to vector<1x32xf32>
    %c2 = arith.constant 2 : index
    %c0_47 = arith.constant 0 : index
    %204 = vector.load %arg3[%c2, %c0_47] : memref<16x32xf32, #tpu.memory_space<vmem>>, vector<1x32xf32>
    tpu.vector_store %arg3[%c2, %c0_47], %203 {strides = array<i32>} : memref<16x32xf32, #tpu.memory_space<vmem>>, vector<1x32xf32>,
    %205 = vector.extract_strided_slice %202 {offsets = [1, 0], sizes = [1, 32], strides = [1, 1]} : vector<2x32xf32> to vector<1x32xf32>
    %c10 = arith.constant 10 : index
    %c0_48 = arith.constant 0 : index
    %206 = vector.load %arg3[%c10, %c0_48] : memref<16x32xf32, #tpu.memory_space<vmem>>, vector<1x32xf32>
    tpu.vector_store %arg3[%c10, %c0_48], %205 {strides = array<i32>} : memref<16x32xf32, #tpu.memory_space<vmem>>, vector<1x32xf32>,
    %207 = arith.addf %36, %179 : vector<2x128xf32>
    %208 = vector.broadcast %48 : vector<1x128xf32> to vector<2x128xf32>
    %209 = arith.mulf %207, %208 : vector<2x128xf32>
    %210 = arith.negf %209 : vector<2x128xf32>
    %211 = math.exp %210 : vector<2x128xf32>
    %cst_49 = arith.constant 1.000000e+00 : f32
    %212 = vector.broadcast %cst_49 : f32 to vector<2x128xf32>
    %213 = arith.addf %212, %211 : vector<2x128xf32>
    %214 = arith.divf %212, %213 : vector<2x128xf32>
    %215 = vector.extract_strided_slice %214 {offsets = [0, 0], sizes = [2, 32], strides = [1, 1]} : vector<2x128xf32> to vector<2x32xf32>
    %216 = vector.extract_strided_slice %214 {offsets = [0, 32], sizes = [2, 32], strides = [1, 1]} : vector<2x128xf32> to vector<2x32xf32>
    %217 = vector.extract_strided_slice %214 {offsets = [0, 96], sizes = [2, 32], strides = [1, 1]} : vector<2x128xf32> to vector<2x32xf32>
    %218 = vector.extract_strided_slice %214 {offsets = [0, 64], sizes = [2, 32], strides = [1, 1]} : vector<2x128xf32> to vector<2x32xf32>
    %cst_50 = arith.constant 2.000000e+00 : f32
    %219 = vector.broadcast %cst_50 : f32 to vector<2x32xf32>
    %220 = arith.mulf %219, %218 : vector<2x32xf32>
    %cst_51 = arith.constant 1.000000e+00 : f32
    %221 = vector.broadcast %cst_51 : f32 to vector<2x32xf32>
    %222 = arith.subf %220, %221 : vector<2x32xf32>
    %223 = arith.mulf %216, %173 : vector<2x32xf32>
    %224 = arith.mulf %215, %222 : vector<2x32xf32>
    %225 = arith.addf %223, %224 : vector<2x32xf32>
    %226 = math.tanh %225 : vector<2x32xf32>
    %227 = arith.mulf %217, %226 : vector<2x32xf32>
    %228 = tpu.concatenate %227, %202 in 1 : vector<2x32xf32>, vector<2x32xf32> -> vector<2x64xf32>
    %229 = arith.truncf %228 : vector<2x64xf32> to vector<2x64xbf16>
    %cst_52 = arith.constant dense<0.000000e+00> : vector<2x256xf32>
    %230 = tpu.matmul %229, %38, %cst_52 {dimension_numbers = #tpu.dot_dimension_numbers<[1], [0], [0], [1], [0, 0, 1, 1], [], []>} : vector<2x64xbf16>, vector<64x256xbf16>, vector<2x256xf32> -> vector<2x256xf32>
    %231 = vector.extract_strided_slice %230 {offsets = [0, 0], sizes = [2, 128], strides = [1, 1]} : vector<2x256xf32> to vector<2x128xf32>
    %232 = vector.extract_strided_slice %230 {offsets = [0, 128], sizes = [2, 128], strides = [1, 1]} : vector<2x256xf32> to vector<2x128xf32>
    %233 = vector.broadcast %39 : vector<1x128xf32> to vector<2x128xf32>
    %234 = arith.addf %232, %233 : vector<2x128xf32>
    %235 = vector.broadcast %48 : vector<1x128xf32> to vector<2x128xf32>
    %236 = arith.mulf %234, %235 : vector<2x128xf32>
    %237 = arith.negf %236 : vector<2x128xf32>
    %238 = math.exp %237 : vector<2x128xf32>
    %cst_53 = arith.constant 1.000000e+00 : f32
    %239 = vector.broadcast %cst_53 : f32 to vector<2x128xf32>
    %240 = arith.addf %239, %238 : vector<2x128xf32>
    %241 = arith.divf %239, %240 : vector<2x128xf32>
    %242 = vector.extract_strided_slice %241 {offsets = [0, 0], sizes = [2, 32], strides = [1, 1]} : vector<2x128xf32> to vector<2x32xf32>
    %243 = vector.extract_strided_slice %241 {offsets = [0, 32], sizes = [2, 32], strides = [1, 1]} : vector<2x128xf32> to vector<2x32xf32>
    %244 = vector.extract_strided_slice %241 {offsets = [0, 96], sizes = [2, 32], strides = [1, 1]} : vector<2x128xf32> to vector<2x32xf32>
    %245 = vector.extract_strided_slice %241 {offsets = [0, 64], sizes = [2, 32], strides = [1, 1]} : vector<2x128xf32> to vector<2x32xf32>
    %cst_54 = arith.constant 2.000000e+00 : f32
    %246 = vector.broadcast %cst_54 : f32 to vector<2x32xf32>
    %247 = arith.mulf %246, %245 : vector<2x32xf32>
    %cst_55 = arith.constant 1.000000e+00 : f32
    %248 = vector.broadcast %cst_55 : f32 to vector<2x32xf32>
    %249 = arith.subf %247, %248 : vector<2x32xf32>
    %250 = arith.mulf %243, %200 : vector<2x32xf32>
    %251 = arith.mulf %242, %249 : vector<2x32xf32>
    %252 = arith.addf %250, %251 : vector<2x32xf32>
    %253 = math.tanh %252 : vector<2x32xf32>
    %254 = arith.mulf %244, %253 : vector<2x32xf32>
    %255 = vector.extract_strided_slice %254 {offsets = [0, 0], sizes = [1, 32], strides = [1, 1]} : vector<2x32xf32> to vector<1x32xf32>
    %c3 = arith.constant 3 : index
    %c0_56 = arith.constant 0 : index
    %256 = vector.load %arg3[%c3, %c0_56] : memref<16x32xf32, #tpu.memory_space<vmem>>, vector<1x32xf32>
    tpu.vector_store %arg3[%c3, %c0_56], %255 {strides = array<i32>} : memref<16x32xf32, #tpu.memory_space<vmem>>, vector<1x32xf32>,
    %257 = vector.extract_strided_slice %254 {offsets = [1, 0], sizes = [1, 32], strides = [1, 1]} : vector<2x32xf32> to vector<1x32xf32>
    %c11 = arith.constant 11 : index
    %c0_57 = arith.constant 0 : index
    %258 = vector.load %arg3[%c11, %c0_57] : memref<16x32xf32, #tpu.memory_space<vmem>>, vector<1x32xf32>
    tpu.vector_store %arg3[%c11, %c0_57], %257 {strides = array<i32>} : memref<16x32xf32, #tpu.memory_space<vmem>>, vector<1x32xf32>,
    %259 = arith.addf %36, %231 : vector<2x128xf32>
    %260 = vector.broadcast %48 : vector<1x128xf32> to vector<2x128xf32>
    %261 = arith.mulf %259, %260 : vector<2x128xf32>
    %262 = arith.negf %261 : vector<2x128xf32>
    %263 = math.exp %262 : vector<2x128xf32>
    %cst_58 = arith.constant 1.000000e+00 : f32
    %264 = vector.broadcast %cst_58 : f32 to vector<2x128xf32>
    %265 = arith.addf %264, %263 : vector<2x128xf32>
    %266 = arith.divf %264, %265 : vector<2x128xf32>
    %267 = vector.extract_strided_slice %266 {offsets = [0, 0], sizes = [2, 32], strides = [1, 1]} : vector<2x128xf32> to vector<2x32xf32>
    %268 = vector.extract_strided_slice %266 {offsets = [0, 32], sizes = [2, 32], strides = [1, 1]} : vector<2x128xf32> to vector<2x32xf32>
    %269 = vector.extract_strided_slice %266 {offsets = [0, 96], sizes = [2, 32], strides = [1, 1]} : vector<2x128xf32> to vector<2x32xf32>
    %270 = vector.extract_strided_slice %266 {offsets = [0, 64], sizes = [2, 32], strides = [1, 1]} : vector<2x128xf32> to vector<2x32xf32>
    %cst_59 = arith.constant 2.000000e+00 : f32
    %271 = vector.broadcast %cst_59 : f32 to vector<2x32xf32>
    %272 = arith.mulf %271, %270 : vector<2x32xf32>
    %cst_60 = arith.constant 1.000000e+00 : f32
    %273 = vector.broadcast %cst_60 : f32 to vector<2x32xf32>
    %274 = arith.subf %272, %273 : vector<2x32xf32>
    %275 = arith.mulf %268, %225 : vector<2x32xf32>
    %276 = arith.mulf %267, %274 : vector<2x32xf32>
    %277 = arith.addf %275, %276 : vector<2x32xf32>
    %278 = math.tanh %277 : vector<2x32xf32>
    %279 = arith.mulf %269, %278 : vector<2x32xf32>
    %280 = tpu.concatenate %279, %254 in 1 : vector<2x32xf32>, vector<2x32xf32> -> vector<2x64xf32>
    %281 = arith.truncf %280 : vector<2x64xf32> to vector<2x64xbf16>
    %cst_61 = arith.constant dense<0.000000e+00> : vector<2x256xf32>
    %282 = tpu.matmul %281, %38, %cst_61 {dimension_numbers = #tpu.dot_dimension_numbers<[1], [0], [0], [1], [0, 0, 1, 1], [], []>} : vector<2x64xbf16>, vector<64x256xbf16>, vector<2x256xf32> -> vector<2x256xf32>
    %283 = vector.extract_strided_slice %282 {offsets = [0, 0], sizes = [2, 128], strides = [1, 1]} : vector<2x256xf32> to vector<2x128xf32>
    %284 = vector.extract_strided_slice %282 {offsets = [0, 128], sizes = [2, 128], strides = [1, 1]} : vector<2x256xf32> to vector<2x128xf32>
    %285 = vector.broadcast %39 : vector<1x128xf32> to vector<2x128xf32>
    %286 = arith.addf %284, %285 : vector<2x128xf32>
    %287 = vector.broadcast %48 : vector<1x128xf32> to vector<2x128xf32>
    %288 = arith.mulf %286, %287 : vector<2x128xf32>
    %289 = arith.negf %288 : vector<2x128xf32>
    %290 = math.exp %289 : vector<2x128xf32>
    %cst_62 = arith.constant 1.000000e+00 : f32
    %291 = vector.broadcast %cst_62 : f32 to vector<2x128xf32>
    %292 = arith.addf %291, %290 : vector<2x128xf32>
    %293 = arith.divf %291, %292 : vector<2x128xf32>
    %294 = vector.extract_strided_slice %293 {offsets = [0, 0], sizes = [2, 32], strides = [1, 1]} : vector<2x128xf32> to vector<2x32xf32>
    %295 = vector.extract_strided_slice %293 {offsets = [0, 32], sizes = [2, 32], strides = [1, 1]} : vector<2x128xf32> to vector<2x32xf32>
    %296 = vector.extract_strided_slice %293 {offsets = [0, 96], sizes = [2, 32], strides = [1, 1]} : vector<2x128xf32> to vector<2x32xf32>
    %297 = vector.extract_strided_slice %293 {offsets = [0, 64], sizes = [2, 32], strides = [1, 1]} : vector<2x128xf32> to vector<2x32xf32>
    %cst_63 = arith.constant 2.000000e+00 : f32
    %298 = vector.broadcast %cst_63 : f32 to vector<2x32xf32>
    %299 = arith.mulf %298, %297 : vector<2x32xf32>
    %cst_64 = arith.constant 1.000000e+00 : f32
    %300 = vector.broadcast %cst_64 : f32 to vector<2x32xf32>
    %301 = arith.subf %299, %300 : vector<2x32xf32>
    %302 = arith.mulf %295, %252 : vector<2x32xf32>
    %303 = arith.mulf %294, %301 : vector<2x32xf32>
    %304 = arith.addf %302, %303 : vector<2x32xf32>
    %305 = math.tanh %304 : vector<2x32xf32>
    %306 = arith.mulf %296, %305 : vector<2x32xf32>
    %307 = vector.extract_strided_slice %306 {offsets = [0, 0], sizes = [1, 32], strides = [1, 1]} : vector<2x32xf32> to vector<1x32xf32>
    %c4 = arith.constant 4 : index
    %c0_65 = arith.constant 0 : index
    %308 = vector.load %arg3[%c4, %c0_65] : memref<16x32xf32, #tpu.memory_space<vmem>>, vector<1x32xf32>
    tpu.vector_store %arg3[%c4, %c0_65], %307 {strides = array<i32>} : memref<16x32xf32, #tpu.memory_space<vmem>>, vector<1x32xf32>,
    %309 = vector.extract_strided_slice %306 {offsets = [1, 0], sizes = [1, 32], strides = [1, 1]} : vector<2x32xf32> to vector<1x32xf32>
    %c12 = arith.constant 12 : index
    %c0_66 = arith.constant 0 : index
    %310 = vector.load %arg3[%c12, %c0_66] : memref<16x32xf32, #tpu.memory_space<vmem>>, vector<1x32xf32>
    tpu.vector_store %arg3[%c12, %c0_66], %309 {strides = array<i32>} : memref<16x32xf32, #tpu.memory_space<vmem>>, vector<1x32xf32>,
    %311 = arith.addf %36, %283 : vector<2x128xf32>
    %312 = vector.broadcast %48 : vector<1x128xf32> to vector<2x128xf32>
    %313 = arith.mulf %311, %312 : vector<2x128xf32>
    %314 = arith.negf %313 : vector<2x128xf32>
    %315 = math.exp %314 : vector<2x128xf32>
    %cst_67 = arith.constant 1.000000e+00 : f32
    %316 = vector.broadcast %cst_67 : f32 to vector<2x128xf32>
    %317 = arith.addf %316, %315 : vector<2x128xf32>
    %318 = arith.divf %316, %317 : vector<2x128xf32>
    %319 = vector.extract_strided_slice %318 {offsets = [0, 0], sizes = [2, 32], strides = [1, 1]} : vector<2x128xf32> to vector<2x32xf32>
    %320 = vector.extract_strided_slice %318 {offsets = [0, 32], sizes = [2, 32], strides = [1, 1]} : vector<2x128xf32> to vector<2x32xf32>
    %321 = vector.extract_strided_slice %318 {offsets = [0, 96], sizes = [2, 32], strides = [1, 1]} : vector<2x128xf32> to vector<2x32xf32>
    %322 = vector.extract_strided_slice %318 {offsets = [0, 64], sizes = [2, 32], strides = [1, 1]} : vector<2x128xf32> to vector<2x32xf32>
    %cst_68 = arith.constant 2.000000e+00 : f32
    %323 = vector.broadcast %cst_68 : f32 to vector<2x32xf32>
    %324 = arith.mulf %323, %322 : vector<2x32xf32>
    %cst_69 = arith.constant 1.000000e+00 : f32
    %325 = vector.broadcast %cst_69 : f32 to vector<2x32xf32>
    %326 = arith.subf %324, %325 : vector<2x32xf32>
    %327 = arith.mulf %320, %277 : vector<2x32xf32>
    %328 = arith.mulf %319, %326 : vector<2x32xf32>
    %329 = arith.addf %327, %328 : vector<2x32xf32>
    %330 = math.tanh %329 : vector<2x32xf32>
    %331 = arith.mulf %321, %330 : vector<2x32xf32>
    %332 = tpu.concatenate %331, %306 in 1 : vector<2x32xf32>, vector<2x32xf32> -> vector<2x64xf32>
    %333 = arith.truncf %332 : vector<2x64xf32> to vector<2x64xbf16>
    %cst_70 = arith.constant dense<0.000000e+00> : vector<2x256xf32>
    %334 = tpu.matmul %333, %38, %cst_70 {dimension_numbers = #tpu.dot_dimension_numbers<[1], [0], [0], [1], [0, 0, 1, 1], [], []>} : vector<2x64xbf16>, vector<64x256xbf16>, vector<2x256xf32> -> vector<2x256xf32>
    %335 = vector.extract_strided_slice %334 {offsets = [0, 0], sizes = [2, 128], strides = [1, 1]} : vector<2x256xf32> to vector<2x128xf32>
    %336 = vector.extract_strided_slice %334 {offsets = [0, 128], sizes = [2, 128], strides = [1, 1]} : vector<2x256xf32> to vector<2x128xf32>
    %337 = vector.broadcast %39 : vector<1x128xf32> to vector<2x128xf32>
    %338 = arith.addf %336, %337 : vector<2x128xf32>
    %339 = vector.broadcast %48 : vector<1x128xf32> to vector<2x128xf32>
    %340 = arith.mulf %338, %339 : vector<2x128xf32>
    %341 = arith.negf %340 : vector<2x128xf32>
    %342 = math.exp %341 : vector<2x128xf32>
    %cst_71 = arith.constant 1.000000e+00 : f32
    %343 = vector.broadcast %cst_71 : f32 to vector<2x128xf32>
    %344 = arith.addf %343, %342 : vector<2x128xf32>
    %345 = arith.divf %343, %344 : vector<2x128xf32>
    %346 = vector.extract_strided_slice %345 {offsets = [0, 0], sizes = [2, 32], strides = [1, 1]} : vector<2x128xf32> to vector<2x32xf32>
    %347 = vector.extract_strided_slice %345 {offsets = [0, 32], sizes = [2, 32], strides = [1, 1]} : vector<2x128xf32> to vector<2x32xf32>
    %348 = vector.extract_strided_slice %345 {offsets = [0, 96], sizes = [2, 32], strides = [1, 1]} : vector<2x128xf32> to vector<2x32xf32>
    %349 = vector.extract_strided_slice %345 {offsets = [0, 64], sizes = [2, 32], strides = [1, 1]} : vector<2x128xf32> to vector<2x32xf32>
    %cst_72 = arith.constant 2.000000e+00 : f32
    %350 = vector.broadcast %cst_72 : f32 to vector<2x32xf32>
    %351 = arith.mulf %350, %349 : vector<2x32xf32>
    %cst_73 = arith.constant 1.000000e+00 : f32
    %352 = vector.broadcast %cst_73 : f32 to vector<2x32xf32>
    %353 = arith.subf %351, %352 : vector<2x32xf32>
    %354 = arith.mulf %347, %304 : vector<2x32xf32>
    %355 = arith.mulf %346, %353 : vector<2x32xf32>
    %356 = arith.addf %354, %355 : vector<2x32xf32>
    %357 = math.tanh %356 : vector<2x32xf32>
    %358 = arith.mulf %348, %357 : vector<2x32xf32>
    %359 = vector.extract_strided_slice %358 {offsets = [0, 0], sizes = [1, 32], strides = [1, 1]} : vector<2x32xf32> to vector<1x32xf32>
    %c5 = arith.constant 5 : index
    %c0_74 = arith.constant 0 : index
    %360 = vector.load %arg3[%c5, %c0_74] : memref<16x32xf32, #tpu.memory_space<vmem>>, vector<1x32xf32>
    tpu.vector_store %arg3[%c5, %c0_74], %359 {strides = array<i32>} : memref<16x32xf32, #tpu.memory_space<vmem>>, vector<1x32xf32>,
    %361 = vector.extract_strided_slice %358 {offsets = [1, 0], sizes = [1, 32], strides = [1, 1]} : vector<2x32xf32> to vector<1x32xf32>
    %c13 = arith.constant 13 : index
    %c0_75 = arith.constant 0 : index
    %362 = vector.load %arg3[%c13, %c0_75] : memref<16x32xf32, #tpu.memory_space<vmem>>, vector<1x32xf32>
    tpu.vector_store %arg3[%c13, %c0_75], %361 {strides = array<i32>} : memref<16x32xf32, #tpu.memory_space<vmem>>, vector<1x32xf32>,
    %363 = arith.addf %36, %335 : vector<2x128xf32>
    %364 = vector.broadcast %48 : vector<1x128xf32> to vector<2x128xf32>
    %365 = arith.mulf %363, %364 : vector<2x128xf32>
    %366 = arith.negf %365 : vector<2x128xf32>
    %367 = math.exp %366 : vector<2x128xf32>
    %cst_76 = arith.constant 1.000000e+00 : f32
    %368 = vector.broadcast %cst_76 : f32 to vector<2x128xf32>
    %369 = arith.addf %368, %367 : vector<2x128xf32>
    %370 = arith.divf %368, %369 : vector<2x128xf32>
    %371 = vector.extract_strided_slice %370 {offsets = [0, 0], sizes = [2, 32], strides = [1, 1]} : vector<2x128xf32> to vector<2x32xf32>
    %372 = vector.extract_strided_slice %370 {offsets = [0, 32], sizes = [2, 32], strides = [1, 1]} : vector<2x128xf32> to vector<2x32xf32>
    %373 = vector.extract_strided_slice %370 {offsets = [0, 96], sizes = [2, 32], strides = [1, 1]} : vector<2x128xf32> to vector<2x32xf32>
    %374 = vector.extract_strided_slice %370 {offsets = [0, 64], sizes = [2, 32], strides = [1, 1]} : vector<2x128xf32> to vector<2x32xf32>
    %cst_77 = arith.constant 2.000000e+00 : f32
    %375 = vector.broadcast %cst_77 : f32 to vector<2x32xf32>
    %376 = arith.mulf %375, %374 : vector<2x32xf32>
    %cst_78 = arith.constant 1.000000e+00 : f32
    %377 = vector.broadcast %cst_78 : f32 to vector<2x32xf32>
    %378 = arith.subf %376, %377 : vector<2x32xf32>
    %379 = arith.mulf %372, %329 : vector<2x32xf32>
    %380 = arith.mulf %371, %378 : vector<2x32xf32>
    %381 = arith.addf %379, %380 : vector<2x32xf32>
    %382 = math.tanh %381 : vector<2x32xf32>
    %383 = arith.mulf %373, %382 : vector<2x32xf32>
    %384 = tpu.concatenate %383, %358 in 1 : vector<2x32xf32>, vector<2x32xf32> -> vector<2x64xf32>
    %385 = arith.truncf %384 : vector<2x64xf32> to vector<2x64xbf16>
    %cst_79 = arith.constant dense<0.000000e+00> : vector<2x256xf32>
    %386 = tpu.matmul %385, %38, %cst_79 {dimension_numbers = #tpu.dot_dimension_numbers<[1], [0], [0], [1], [0, 0, 1, 1], [], []>} : vector<2x64xbf16>, vector<64x256xbf16>, vector<2x256xf32> -> vector<2x256xf32>
    %387 = vector.extract_strided_slice %386 {offsets = [0, 0], sizes = [2, 128], strides = [1, 1]} : vector<2x256xf32> to vector<2x128xf32>
    %388 = vector.extract_strided_slice %386 {offsets = [0, 128], sizes = [2, 128], strides = [1, 1]} : vector<2x256xf32> to vector<2x128xf32>
    %389 = vector.broadcast %39 : vector<1x128xf32> to vector<2x128xf32>
    %390 = arith.addf %388, %389 : vector<2x128xf32>
    %391 = vector.broadcast %48 : vector<1x128xf32> to vector<2x128xf32>
    %392 = arith.mulf %390, %391 : vector<2x128xf32>
    %393 = arith.negf %392 : vector<2x128xf32>
    %394 = math.exp %393 : vector<2x128xf32>
    %cst_80 = arith.constant 1.000000e+00 : f32
    %395 = vector.broadcast %cst_80 : f32 to vector<2x128xf32>
    %396 = arith.addf %395, %394 : vector<2x128xf32>
    %397 = arith.divf %395, %396 : vector<2x128xf32>
    %398 = vector.extract_strided_slice %397 {offsets = [0, 0], sizes = [2, 32], strides = [1, 1]} : vector<2x128xf32> to vector<2x32xf32>
    %399 = vector.extract_strided_slice %397 {offsets = [0, 32], sizes = [2, 32], strides = [1, 1]} : vector<2x128xf32> to vector<2x32xf32>
    %400 = vector.extract_strided_slice %397 {offsets = [0, 96], sizes = [2, 32], strides = [1, 1]} : vector<2x128xf32> to vector<2x32xf32>
    %401 = vector.extract_strided_slice %397 {offsets = [0, 64], sizes = [2, 32], strides = [1, 1]} : vector<2x128xf32> to vector<2x32xf32>
    %cst_81 = arith.constant 2.000000e+00 : f32
    %402 = vector.broadcast %cst_81 : f32 to vector<2x32xf32>
    %403 = arith.mulf %402, %401 : vector<2x32xf32>
    %cst_82 = arith.constant 1.000000e+00 : f32
    %404 = vector.broadcast %cst_82 : f32 to vector<2x32xf32>
    %405 = arith.subf %403, %404 : vector<2x32xf32>
    %406 = arith.mulf %399, %356 : vector<2x32xf32>
    %407 = arith.mulf %398, %405 : vector<2x32xf32>
    %408 = arith.addf %406, %407 : vector<2x32xf32>
    %409 = math.tanh %408 : vector<2x32xf32>
    %410 = arith.mulf %400, %409 : vector<2x32xf32>
    %411 = vector.extract_strided_slice %410 {offsets = [0, 0], sizes = [1, 32], strides = [1, 1]} : vector<2x32xf32> to vector<1x32xf32>
    %c6 = arith.constant 6 : index
    %c0_83 = arith.constant 0 : index
    %412 = vector.load %arg3[%c6, %c0_83] : memref<16x32xf32, #tpu.memory_space<vmem>>, vector<1x32xf32>
    tpu.vector_store %arg3[%c6, %c0_83], %411 {strides = array<i32>} : memref<16x32xf32, #tpu.memory_space<vmem>>, vector<1x32xf32>,
    %413 = vector.extract_strided_slice %410 {offsets = [1, 0], sizes = [1, 32], strides = [1, 1]} : vector<2x32xf32> to vector<1x32xf32>
    %c14 = arith.constant 14 : index
    %c0_84 = arith.constant 0 : index
    %414 = vector.load %arg3[%c14, %c0_84] : memref<16x32xf32, #tpu.memory_space<vmem>>, vector<1x32xf32>
    tpu.vector_store %arg3[%c14, %c0_84], %413 {strides = array<i32>} : memref<16x32xf32, #tpu.memory_space<vmem>>, vector<1x32xf32>,
    %415 = arith.addf %36, %387 : vector<2x128xf32>
    %416 = vector.broadcast %48 : vector<1x128xf32> to vector<2x128xf32>
    %417 = arith.mulf %415, %416 : vector<2x128xf32>
    %418 = arith.negf %417 : vector<2x128xf32>
    %419 = math.exp %418 : vector<2x128xf32>
    %cst_85 = arith.constant 1.000000e+00 : f32
    %420 = vector.broadcast %cst_85 : f32 to vector<2x128xf32>
    %421 = arith.addf %420, %419 : vector<2x128xf32>
    %422 = arith.divf %420, %421 : vector<2x128xf32>
    %423 = vector.extract_strided_slice %422 {offsets = [0, 0], sizes = [2, 32], strides = [1, 1]} : vector<2x128xf32> to vector<2x32xf32>
    %424 = vector.extract_strided_slice %422 {offsets = [0, 32], sizes = [2, 32], strides = [1, 1]} : vector<2x128xf32> to vector<2x32xf32>
    %425 = vector.extract_strided_slice %422 {offsets = [0, 96], sizes = [2, 32], strides = [1, 1]} : vector<2x128xf32> to vector<2x32xf32>
    %426 = vector.extract_strided_slice %422 {offsets = [0, 64], sizes = [2, 32], strides = [1, 1]} : vector<2x128xf32> to vector<2x32xf32>
    %cst_86 = arith.constant 2.000000e+00 : f32
    %427 = vector.broadcast %cst_86 : f32 to vector<2x32xf32>
    %428 = arith.mulf %427, %426 : vector<2x32xf32>
    %cst_87 = arith.constant 1.000000e+00 : f32
    %429 = vector.broadcast %cst_87 : f32 to vector<2x32xf32>
    %430 = arith.subf %428, %429 : vector<2x32xf32>
    %431 = arith.mulf %424, %381 : vector<2x32xf32>
    %432 = arith.mulf %423, %430 : vector<2x32xf32>
    %433 = arith.addf %431, %432 : vector<2x32xf32>
    %434 = math.tanh %433 : vector<2x32xf32>
    %435 = arith.mulf %425, %434 : vector<2x32xf32>
    %436 = tpu.concatenate %435, %410 in 1 : vector<2x32xf32>, vector<2x32xf32> -> vector<2x64xf32>
    %437 = arith.truncf %436 : vector<2x64xf32> to vector<2x64xbf16>
    %cst_88 = arith.constant dense<0.000000e+00> : vector<2x256xf32>
    %438 = tpu.matmul %437, %38, %cst_88 {dimension_numbers = #tpu.dot_dimension_numbers<[1], [0], [0], [1], [0, 0, 1, 1], [], []>} : vector<2x64xbf16>, vector<64x256xbf16>, vector<2x256xf32> -> vector<2x256xf32>
    %439 = vector.extract_strided_slice %438 {offsets = [0, 128], sizes = [2, 128], strides = [1, 1]} : vector<2x256xf32> to vector<2x128xf32>
    %440 = vector.broadcast %39 : vector<1x128xf32> to vector<2x128xf32>
    %441 = arith.addf %439, %440 : vector<2x128xf32>
    %442 = vector.broadcast %48 : vector<1x128xf32> to vector<2x128xf32>
    %443 = arith.mulf %441, %442 : vector<2x128xf32>
    %444 = arith.negf %443 : vector<2x128xf32>
    %445 = math.exp %444 : vector<2x128xf32>
    %cst_89 = arith.constant 1.000000e+00 : f32
    %446 = vector.broadcast %cst_89 : f32 to vector<2x128xf32>
    %447 = arith.addf %446, %445 : vector<2x128xf32>
    %448 = arith.divf %446, %447 : vector<2x128xf32>
    %449 = vector.extract_strided_slice %448 {offsets = [0, 0], sizes = [2, 32], strides = [1, 1]} : vector<2x128xf32> to vector<2x32xf32>
    %450 = vector.extract_strided_slice %448 {offsets = [0, 32], sizes = [2, 32], strides = [1, 1]} : vector<2x128xf32> to vector<2x32xf32>
    %451 = vector.extract_strided_slice %448 {offsets = [0, 96], sizes = [2, 32], strides = [1, 1]} : vector<2x128xf32> to vector<2x32xf32>
    %452 = vector.extract_strided_slice %448 {offsets = [0, 64], sizes = [2, 32], strides = [1, 1]} : vector<2x128xf32> to vector<2x32xf32>
    %cst_90 = arith.constant 2.000000e+00 : f32
    %453 = vector.broadcast %cst_90 : f32 to vector<2x32xf32>
    %454 = arith.mulf %453, %452 : vector<2x32xf32>
    %cst_91 = arith.constant 1.000000e+00 : f32
    %455 = vector.broadcast %cst_91 : f32 to vector<2x32xf32>
    %456 = arith.subf %454, %455 : vector<2x32xf32>
    %457 = arith.mulf %450, %408 : vector<2x32xf32>
    %458 = arith.mulf %449, %456 : vector<2x32xf32>
    %459 = arith.addf %457, %458 : vector<2x32xf32>
    %460 = math.tanh %459 : vector<2x32xf32>
    %461 = arith.mulf %451, %460 : vector<2x32xf32>
    %462 = vector.extract_strided_slice %461 {offsets = [0, 0], sizes = [1, 32], strides = [1, 1]} : vector<2x32xf32> to vector<1x32xf32>
    %c7 = arith.constant 7 : index
    %c0_92 = arith.constant 0 : index
    %463 = vector.load %arg3[%c7, %c0_92] : memref<16x32xf32, #tpu.memory_space<vmem>>, vector<1x32xf32>
    tpu.vector_store %arg3[%c7, %c0_92], %462 {strides = array<i32>} : memref<16x32xf32, #tpu.memory_space<vmem>>, vector<1x32xf32>,
    %464 = vector.extract_strided_slice %461 {offsets = [1, 0], sizes = [1, 32], strides = [1, 1]} : vector<2x32xf32> to vector<1x32xf32>
    %c15 = arith.constant 15 : index
    %c0_93 = arith.constant 0 : index
    %465 = vector.load %arg3[%c15, %c0_93] : memref<16x32xf32, #tpu.memory_space<vmem>>, vector<1x32xf32>
    tpu.vector_store %arg3[%c15, %c0_93], %464 {strides = array<i32>} : memref<16x32xf32, #tpu.memory_space<vmem>>, vector<1x32xf32>,
    %c0_94 = arith.constant 0 : index
    %c0_95 = arith.constant 0 : index
    %466 = vector.load %arg3[%c0_94, %c0_95] : memref<16x32xf32, #tpu.memory_space<vmem>>, vector<16x32xf32>
    %c168 = arith.constant 168 : index
    %c0_96 = arith.constant 0 : index
    %467 = vector.load %arg1[%c168, %c0_96] : memref<264x256xf32, #tpu.memory_space<vmem>>, vector<32x64xf32>
    %c133 = arith.constant 133 : index
    %c0_97 = arith.constant 0 : index
    %468 = vector.load %arg1[%c133, %c0_97] : memref<264x256xf32, #tpu.memory_space<vmem>>, vector<1x64xf32>
    %c200 = arith.constant 200 : index
    %c0_98 = arith.constant 0 : index
    %469 = vector.load %arg1[%c200, %c0_98] : memref<264x256xf32, #tpu.memory_space<vmem>>, vector<64x128xf32>
    %c134 = arith.constant 134 : index
    %c0_99 = arith.constant 0 : index
    %470 = vector.load %arg1[%c134, %c0_99] : memref<264x256xf32, #tpu.memory_space<vmem>>, vector<1x128xf32>
    %cst_100 = arith.constant dense<0.000000e+00> : vector<16x64xf32>
    %471 = tpu.matmul %466, %467, %cst_100 {dimension_numbers = #tpu.dot_dimension_numbers<[1], [0], [0], [1], [0, 0, 1, 1], [], []>} : vector<16x32xf32>, vector<32x64xf32>, vector<16x64xf32> -> vector<16x64xf32>
    %472 = vector.broadcast %468 : vector<1x64xf32> to vector<16x64xf32>
    %473 = arith.addf %471, %472 : vector<16x64xf32>
    %cst_101 = arith.constant 0.000000e+00 : f32
    %474 = vector.broadcast %cst_101 : f32 to vector<16x64xf32>
    %475 = arith.maximumf %473, %474 : vector<16x64xf32>
    %cst_102 = arith.constant dense<0.000000e+00> : vector<16x128xf32>
    %476 = tpu.matmul %475, %469, %cst_102 {dimension_numbers = #tpu.dot_dimension_numbers<[1], [0], [0], [1], [0, 0, 1, 1], [], []>} : vector<16x64xf32>, vector<64x128xf32>, vector<16x128xf32> -> vector<16x128xf32>
    %477 = vector.broadcast %470 : vector<1x128xf32> to vector<16x128xf32>
    %478 = arith.addf %476, %477 : vector<16x128xf32>
    %c0_103 = arith.constant 0 : index
    %c0_104 = arith.constant 0 : index
    %479 = vector.load %arg2[%c0_103, %c0_104] : memref<16x128xf32, #tpu.memory_space<vmem>>, vector<16x128xf32>
    tpu.vector_store %arg2[%c0_103, %c0_104], %478 {strides = array<i32>} : memref<16x128xf32, #tpu.memory_space<vmem>>, vector<16x128xf32>,
    return
  }
}

</mosaic_0001>

<bundles_post_ra>
// kernel: text_decoder_forward.1
= control target key start
LH: loop header
LB: loop body
LE: loop exit
PB: predicated region body
PF: predicated region fallthrough
CT: control target
= control target key end

     0   :  { %7 = vsyncpa [#allocation4], 0  ;;  %s1844_s0 = inlined_call_operand.hbm [shape: f32[2,64], index: 0, kind: input, shape index: {}]   ;;  %s1845_s1 = inlined_call_operand.hbm [shape: f32[264,256], index: 1, kind: input, shape index: {}]   ;;  %s1846_s2 = inlined_call_operand.hbm [shape: f32[16,128], index: 2, kind: output, shape index: {}]  }
   0x1   :  { %8 = vsyncpa [#allocation7], 0 }
   0x2   :  { %9 = vsyncpa [#allocation5], 0  ;;  %s15_s11 = sshll.u32 %s1844_s0, 4  ;;  %s1495_s12 = smov [#allocation3]   ;;  %s16_s11 = int_to_ptr.hbm [resolvable:$true] %s15_s11 }
   0x3   :  { %s17_s13 = sshll.u32 %s1495_s12, 4  ;;  %s25_s16 = sshll.u32 %s1845_s1, 4  ;;  %s18_s13 = int_to_ptr.vmem [resolvable:$true] %s17_s13  ;;  %s26_s16 = int_to_ptr.hbm [resolvable:$true] %s25_s16 }
   0x4   :  { %20 = dma.hbm_to_vmem [thread:$0]  %s16_s11, 32, %s18_s13, [#allocation4]  }
   0x5   :  { %s1496_s17 = smov [#allocation6]   ;;  %s1497_s19 = smov 256  }
   0x6   :  { %s27_s18 = sshll.u32 %s1496_s17, 4  ;;  %s1498_s20 = smov 16   ;;  %s28_s18 = int_to_ptr.vmem [resolvable:$true] %s27_s18 }
   0x7   :  { %33 = dma.hbm_to_vmem [thread:$0]  %s26_s16, 8448, %s28_s18, [#allocation7], %s1497_s19, %s1497_s19, %s1498_s20  }
   0x8   :  { %1489 = dma.done.wait [#allocation4], 32  }
   0x9   :  { %1490 = vsyncadd [#allocation4], 4294967264 }
   0xa   :  { %1491 = dma.done.wait [#allocation7], 8448  }
   0xb   :  { %1492 = vsyncadd [#allocation7], 4294958848  ;;  %v50_v0 = vld [vmem:[#allocation6 + $0xf0] sm:$0xff]  ;;  %v49_v1 = vld [vmem:[#allocation6 + $0xe0] sm:$0xff]  ;;  %vm60_vm0 = vcmask 523264   ;;  %vm84_vm1 = vcmask 254976   ;;  %v166_v45 = vlaneseq }
   0xc   :  { %72 = vmatpush.msra.mxu0 %v50_v0  ;;  %v48_v2 = vld [vmem:[#allocation6 + $0xd0] sm:$0xff]  ;;  %v47_v3 = vld [vmem:[#allocation6 + $0xc0] sm:$0xff]  ;;  %v59_v8 = vld [vmem:[#allocation3] sm:$0x3]  ;;  %v1499_v13 = vmov 32.0   ;;  %vm117_vm6 = vcmask 261120  }
   0xd   :  { %v46_v4 = vld [vmem:[#allocation6 + $0xb0] sm:$0xff]  ;;  %v45_v5 = vld [vmem:[#allocation6 + $0xa0] sm:$0xff]  ;;  %1316 = vrcp.f32 %v1499_v13  ;;  %v167_v46 = vand.u32 127, %v166_v45  ;;  %v1500_v49 = vmov 1.0   ;;  %s1501_s0 = smov 64   ;;  %s1502_s1 = smov 32  }
   0xe   :  { %73 = vmatpush.msra.mxu0 %v49_v1  ;;  %v44_v6 = vld [vmem:[#allocation6 + $0x90] sm:$0xff]  ;;  %v43_v7 = vld [vmem:[#allocation6 + $0x80] sm:$0xff]  ;;  %s1503_s21 = smov [#allocation8]   ;;  %s1234_s25 = sshll.u32 %s1846_s2, 4  ;;  %s1235_s25 = int_to_ptr.hbm [resolvable:$true] %s1234_s25 }
   0xf   :  { %v51_v9 = vld [vmem:[#allocation6 + $0x100] ss:$0 sm:$0xff]  ;;  %v56_v26 = vld [vmem:[#allocation6 + $0x130] sm:$0xff]  ;;  %v52_v39 = vld [vmem:[#allocation6 + $0x101] ss:$0 sm:$0xff]  ;;  %vm168_vm7 = vcmp.ge.s32.totalorder %v167_v46, 64 }
  0x10   :  { %74 = vmatpush.msra.mxu0 %v48_v2  ;;  %v57_v25 = vld [vmem:[#allocation6 + $0x140] sm:$0xff]  ;;  %v54_v28 = vld [vmem:[#allocation6 + $0x110] sm:$0xff]  ;;  %vm169_vm8 = vcmp.lt.s32.totalorder %v167_v46, 96  ;;  %s1232_s22 = sshll.u32 %s1503_s21, 4  ;;  %s1504_s26 = smov 128   ;;  %s1233_s22 = int_to_ptr.vmem [resolvable:$true] %s1232_s22 }
  0x11   :  { %133 = vmatpush.msra.mxu1 %v57_v25  ;;  %v55_v27 = vld [vmem:[#allocation6 + $0x120] sm:$0xff]  ;;  %vm170_vm9 = vmand %vm168_vm7, %vm169_vm8  ;;  %v148_v25 = vld [vmem:[#allocation6 + $0x38] sm:$0xff]  ;;  %s1505_s27 = smov 8  }
  0x12   :  { %75 = vmatpush.msra.mxu0 %v47_v3  ;;  %v53_v41 = vld [vmem:[#allocation6 + $0x102] ss:$0 sm:$0xff]  ;;  %v58_v47 = vld [vmem:[#allocation6 + $0x103] ss:$0 sm:$0xff]  ;;  %v1531_v50 = vsel %vm170_vm9, 2.0, %v1500_v49 }
  0x13   :  { %v1317_v14 = vpop.eup %1316  ;;  %134 = vmatpush.msra.mxu1 %v56_v26 }
  0x14   :  { %76 = vmatpush.msra.mxu0 %v46_v4  ;;  %v89_v15 = vmul.f32 32.0, %v1317_v14  ;;  %vm93_vm2 = vweird.f32 %v1317_v14 }
  0x15   :  { %135 = vmatpush.msra.mxu1 %v55_v27 }
  0x16   :  { %77 = vmatpush.msra.mxu0 %v45_v5  ;;  %v90_v16 = vsub.f32 1.0, %v89_v15  ;;  %v149_v15 = vld [vmem:[#allocation6 + $0x40] sm:$0xff] }
  0x17   :  { %136 = vmatpush.msra.mxu1 %v54_v28 }
  0x18   :  { %78 = vmatpush.msra.mxu0 %v44_v6  ;;  %v91_v17 = vmul.f32 %v1317_v14, %v90_v16  ;;  %v151_v16 = vld [vmem:[#allocation6 + $0x50] sm:$0xff] }
  0x1a   :  { %79 = vmatpush.msra.mxu0 %v43_v7  ;;  %v92_v18 = vadd.f32 %v1317_v14, %v91_v17 }
  0x1b   :  { %1248 = vmatmul.msk.f32.vlgmr.msra.gmra.mxu0 %vm60_vm0, %v59_v8 }
  0x1c   :  { %v94_v19 = vsel %vm93_vm2, %v1317_v14, %v92_v18  ;;  %v156_v14 = vld [vmem:[#allocation6 + $0x78] sm:$0xff]  ;;  %v150_v18 = vld [vmem:[#allocation6 + $0x48] sm:$0xff] }
  0x98   :  { %v81_v10 = vpop.f32.mrf.mxu0 }
  0x99   :  { %v82_v11 = vadd.f32 %v81_v10, %v51_v9  ;;  %v153_v10 = vld [vmem:[#allocation6 + $0x60] sm:$0xff] }
  0x9b   :  { %v85_v12 = vsel %vm84_vm1, %v82_v11, 0.0 }
  0x9c   :  { %86 = vadd.xlane.f32.xlu0 %v85_v12  ;;  %v154_v12 = vld [vmem:[#allocation6 + $0x68] sm:$0xff] }
  0x9d   :  { %v1545_v17 = vpack.c.bf16 %v156_v14, %v154_v12 }
  0x9f   :  { %238 = vmatpush.bf16.msra.mxu3 %v1545_v17  ;;  %364 = vmatpush.bf16.msrb.mxu0 %v1545_v17 }
 0x10f   :  { %v87_v20 = vpop.xlane.xlu0 %86 }
 0x110   :  { %v95_v21 = vmul.f32 %v94_v19, %v87_v20  ;;  %v1548_v20 = vpack.c.bf16 %v151_v16, %v149_v15 }
 0x112   :  { %v96_v22 = vsub.f32 %v82_v11, %v95_v21  ;;  %v155_v11 = vld [vmem:[#allocation6 + $0x70] sm:$0xff] }
 0x113   :  { %v1543_v13 = vpack.c.bf16 %v155_v11, %v153_v10 }
 0x114   :  { %v97_v23 = vmul.f32 %v96_v22, %v96_v22 }
 0x115   :  { %225 = vmatpush.bf16.msra.mxu2 %v1543_v13  ;;  %351 = vmatpush.bf16.msrb.mxu1 %v1543_v13 }
 0x116   :  { %v98_v24 = vsel %vm84_vm1, %v97_v23, 0.0  ;;  %v147_v23 = vld [vmem:[#allocation6 + $0x30] sm:$0xff] }
 0x117   :  { %99 = vadd.xlane.f32.xlu0 %v98_v24  ;;  %v146_v24 = vld [vmem:[#allocation6 + $0x28] sm:$0xff] }
 0x118   :  { %v1560_v27 = vpack.c.bf16 %v148_v25, %v146_v24 }
 0x119   :  { %226 = vmatpush.bf16.msra.mxu2 %v1548_v20  ;;  %352 = vmatpush.bf16.msrb.mxu1 %v1548_v20 }
 0x18a   :  { %v100_v29 = vpop.xlane.xlu0 %99 }
 0x18b   :  { %v101_v30 = vmul.f32 %v100_v29, %v94_v19  ;;  %v152_v19 = vld [vmem:[#allocation6 + $0x58] sm:$0xff] }
 0x18c   :  { %v1552_v21 = vpack.c.bf16 %v152_v19, %v150_v18 }
 0x18d   :  { %v102_v31 = vadd.f32 1e-05, %v101_v30  ;;  %v141_v30 = vld [vmem:[#allocation6] sm:$0xff] }
 0x18e   :  { %239 = vmatpush.bf16.msra.mxu3 %v1552_v21  ;;  %365 = vmatpush.bf16.msrb.mxu0 %v1552_v21 }
 0x18f   :  { %1318 = vrsqrt.f32 %v102_v31  ;;  %vm109_vm4 = vweird.f32 %v102_v31 }
 0x192   :  { %240 = vmatpush.bf16.msra.mxu3 %v1560_v27  ;;  %366 = vmatpush.bf16.msrb.mxu0 %v1560_v27 }
 0x195   :  { %v1319_v32 = vpop.eup %1318 }
 0x196   :  { %v104_v33 = vmul.f32 %v1319_v32, %v102_v31  ;;  %vm110_vm3 = vweird.f32 %v1319_v32  ;;  %v143_v31 = vld [vmem:[#allocation6 + $0x10] sm:$0xff] }
 0x197   :  { %vm111_vm5 = vmor %vm109_vm4, %vm110_vm3 }
 0x198   :  { %v105_v34 = vmul.f32 %v1319_v32, %v104_v33  ;;  %v1568_v33 = vpack.c.bf16 %v143_v31, %v141_v30 }
 0x19a   :  { %v106_v35 = vmul.f32 0.5, %v105_v34  ;;  %v144_v34 = vld [vmem:[#allocation6 + $0x18] sm:$0xff] }
 0x19c   :  { %v107_v36 = vsub.f32 1.5, %v106_v35 }
 0x19e   :  { %v108_v37 = vmul.f32 %v1319_v32, %v107_v36 }
 0x1a0   :  { %v112_v38 = vsel %vm111_vm5, %v1319_v32, %v108_v37  ;;  %v142_v32 = vld [vmem:[#allocation6 + $0x8] sm:$0xff] }
 0x1a1   :  { %v113_v40 = vmul.f32 %v112_v38, %v96_v22  ;;  %v145_v22 = vld [vmem:[#allocation6 + $0x20] sm:$0xff]  ;;  %v1570_v35 = vpack.c.bf16 %v144_v34, %v142_v32 }
 0x1a2   :  { %v1556_v26 = vpack.c.bf16 %v147_v23, %v145_v22 }
 0x1a3   :  { %v114_v42 = vmul.f32 %v113_v40, %v52_v39  ;;  %241 = vmatpush.bf16.msra.mxu3 %v1570_v35  ;;  %367 = vmatpush.bf16.msrb.mxu0 %v1570_v35  ;;  %v1603_v39 = vld [vmem:[#allocation6 + $0x104] ss:$0 sm:$0xff] }
 0x1a4   :  { %227 = vmatpush.bf16.msra.mxu2 %v1556_v26  ;;  %353 = vmatpush.bf16.msrb.mxu1 %v1556_v26 }
 0x1a5   :  { %v115_v43 = vadd.f32 %v114_v42, %v53_v41 }
 0x1a7   :  { %v116_v44 = vmax.f32 %v115_v43, 0.0  ;;  %488 = vmatpush.bf16.msrb.mxu3 %v1545_v17  ;;  %612 = vmatpush.bf16.msra.mxu0 %v1545_v17 }
 0x1a8   :  { %228 = vmatpush.bf16.msra.mxu2 %v1568_v33  ;;  %354 = vmatpush.bf16.msrb.mxu1 %v1568_v33 }
 0x1a9   :  { %1249 = vmatmul.msk.f32.vlgmr.msra.gmra.mxu1 %vm117_vm6, %v116_v44 }
 0x1ab   :  { %489 = vmatpush.bf16.msrb.mxu3 %v1552_v21  ;;  %613 = vmatpush.bf16.msra.mxu0 %v1552_v21 }
 0x1ac   :  { %475 = vmatpush.bf16.msrb.mxu2 %v1543_v13  ;;  %599 = vmatpush.bf16.msra.mxu1 %v1543_v13 }
 0x1af   :  { %490 = vmatpush.bf16.msrb.mxu3 %v1560_v27  ;;  %614 = vmatpush.bf16.msra.mxu0 %v1560_v27 }
 0x1b0   :  { %476 = vmatpush.bf16.msrb.mxu2 %v1548_v20  ;;  %600 = vmatpush.bf16.msra.mxu1 %v1548_v20 }
 0x1b3   :  { %491 = vmatpush.bf16.msrb.mxu3 %v1570_v35  ;;  %615 = vmatpush.bf16.msra.mxu0 %v1570_v35 }
 0x1b4   :  { %477 = vmatpush.bf16.msrb.mxu2 %v1556_v26  ;;  %601 = vmatpush.bf16.msra.mxu1 %v1556_v26 }
 0x1b8   :  { %478 = vmatpush.bf16.msrb.mxu2 %v1568_v33  ;;  %602 = vmatpush.bf16.msra.mxu1 %v1568_v33 }
 0x226   :  { %v138_v48 = vpop.f32.mrf.mxu1 }
 0x227   :  { %v1533_v51 = vadd.f32 %v138_v48, %v58_v47 }
 0x229   :  { %v173_v52 = vmul.f32 %v1531_v50, %v1533_v51 }
 0x22b   :  { %v1250_v53 = vmul.f32 -1.442695, %v173_v52 }
 0x22d   :  { %1320 = vpow2.f32 %v1250_v53 }
 0x233   :  { %v1321_v54 = vpop.eup %1320 }
 0x234   :  { %v177_v55 = vadd.f32 1.0, %v1321_v54 }
 0x236   :  { %1322 = vrcp.f32 %v177_v55  ;;  %v189_v59 = vand.u32 2147483648, %v177_v55  ;;  %v187_v61 = vand.u32 2147483647, %v177_v55  ;;  %vm183_vm11 = vweird.f32 %v177_v55 }
 0x238   :  { %v190_v63 = vor.u32 1.1754944e-38, %v189_v59  ;;  %vm188_vm13 = vcmp.eq.f32.partialorder %v187_v61, 8.507059e+37 }
 0x23c   :  { %v1323_v56 = vpop.eup %1322 }
 0x23d   :  { %v179_v57 = vmul.f32 %v1323_v56, %v177_v55  ;;  %vm184_vm10 = vweird.f32 %v1323_v56 }
 0x23e   :  { %vm185_vm12 = vmor %vm183_vm11, %vm184_vm10 }
 0x23f   :  { %v180_v58 = vsub.f32 1.0, %v179_v57 }
 0x241   :  { %v181_v60 = vmul.f32 %v1323_v56, %v180_v58 }
 0x243   :  { %v182_v62 = vadd.f32 %v1323_v56, %v181_v60 }
 0x245   :  { %v186_v0 = vsel %vm185_vm12, %v1323_v56, %v182_v62 }
 0x246   :  { %v191_v1 = vsel %vm188_vm13, %v190_v63, %v186_v0 }
 0x247   :  { %v193_v2 = vmul.f32 2.0, %v191_v1  ;;  %v195_v6 = vmul.f32 0.0, %v191_v1 }
 0x249   :  { %v1251_v3 = vadd.f32 -1.0, %v193_v2 }
 0x24b   :  { %197 = vrot.lane.b32.xlu1 %v1251_v3, %s1501_s0 }
 0x2bd   :  { %v198_v4 = vpop.permute.xlu1 %197 }
 0x2be   :  { %v200_v5 = vmul.f32 %v198_v4, %v191_v1 }
 0x2c0   :  { %202 = vrot.lane.b32.xlu1 %v200_v5, %s1502_s1 }
 0x332   :  { %v203_v7 = vpop.permute.xlu1 %202 }
 0x333   :  { %v1539_v8 = vadd.f32 %v203_v7, %v195_v6 }
 0x335   :  { %1324 = vtanh.f32 %v1539_v8 }
 0x33b   :  { %v1325_v9 = vpop.eup %1324 }
 0x33c   :  { %208 = vrot.lane.b32.xlu2 %v1325_v9, %s1501_s0 }
 0x396   :  { %v209_v28 = vpop.permute.xlu2 %208 }
 0x397   :  { %v211_v29 = vmul.f32 %v209_v28, %v191_v1 }
 0x399   :  { %213 = vrot.lane.b32.xlu2 %v211_v29, %s1502_s1 }
 0x3f3   :  { %v214_v36 = vpop.permute.xlu2 %213 }
 0x3f4   :  { %v216_v37 = vsel %vm117_vm6, %v214_v36, 0.0 }
 0x3f5   :  { %v217_v38 = vpack.c.bf16 %v216_v37, %v216_v37 }
 0x3f7   :  { %1252 = vmatmul.msk.bf16.vlgmr.msra.gmra.mxu2 %vm60_vm0, %v217_v38  ;;  %1253 = vmatmul.msk.bf16.vlgmr.msra.gmra.mxu3 %vm60_vm0, %v217_v38 }
 0x3f8   :  { %723 = vmatpush.bf16.msra.mxu2 %v1543_v13  ;;  %736 = vmatpush.bf16.msra.mxu3 %v1545_v17 }
 0x3fc   :  { %724 = vmatpush.bf16.msra.mxu2 %v1548_v20  ;;  %737 = vmatpush.bf16.msra.mxu3 %v1552_v21 }
 0x400   :  { %725 = vmatpush.bf16.msra.mxu2 %v1556_v26  ;;  %738 = vmatpush.bf16.msra.mxu3 %v1560_v27 }
 0x404   :  { %726 = vmatpush.bf16.msra.mxu2 %v1568_v33  ;;  %739 = vmatpush.bf16.msra.mxu3 %v1570_v35 }
 0x47a   :  { %v230_v40 = vpop.f32.mrf.mxu2  ;;  %v243_v41 = vpop.f32.mrf.mxu3 }
 0x47b   :  { %v295_v42 = vadd.f32 %v230_v40, %v1533_v51  ;;  %v247_v43 = vadd.f32 %v243_v41, %v1603_v39 }
 0x47d   :  { %v296_v44 = vmul.f32 %v295_v42, %v1531_v50  ;;  %v248_v45 = vmul.f32 %v247_v43, %v1531_v50 }
 0x47f   :  { %v1256_v46 = vmul.f32 -1.442695, %v296_v44  ;;  %v1254_v47 = vmul.f32 -1.442695, %v248_v45 }
 0x481   :  { %1326 = vpow2.f32 %v1256_v46 }
 0x482   :  { %1328 = vpow2.f32 %v1254_v47  ;;  %v232_v48 = vpop.f32.mrf.mxu2  ;;  %v245_v49 = vpop.f32.mrf.mxu3 }
 0x487   :  { %v1327_v52 = vpop.eup %1326 }
 0x488   :  { %v1329_v53 = vpop.eup %1328  ;;  %v300_v54 = vadd.f32 1.0, %v1327_v52 }
 0x489   :  { %v252_v55 = vadd.f32 1.0, %v1329_v53 }
 0x48a   :  { %1330 = vrcp.f32 %v300_v54  ;;  %v312_v62 = vand.u32 2147483648, %v300_v54  ;;  %v310_v1 = vand.u32 2147483647, %v300_v54  ;;  %vm306_vm1 = vweird.f32 %v300_v54 }
 0x48b   :  { %1332 = vrcp.f32 %v252_v55  ;;  %v264_v63 = vand.u32 2147483648, %v252_v55  ;;  %v262_v3 = vand.u32 2147483647, %v252_v55  ;;  %vm258_vm2 = vweird.f32 %v252_v55 }
 0x48c   :  { %v313_v6 = vor.u32 1.1754944e-38, %v312_v62  ;;  %vm311_vm5 = vcmp.eq.f32.partialorder %v310_v1, 8.507059e+37 }
 0x48d   :  { %v265_v7 = vor.u32 1.1754944e-38, %v264_v63  ;;  %vm263_vm7 = vcmp.eq.f32.partialorder %v262_v3, 8.507059e+37 }
 0x490   :  { %v1331_v56 = vpop.eup %1330 }
 0x491   :  { %v1333_v57 = vpop.eup %1332  ;;  %v302_v58 = vmul.f32 %v1331_v56, %v300_v54  ;;  %vm307_vm14 = vweird.f32 %v1331_v56 }
 0x492   :  { %v254_v59 = vmul.f32 %v1333_v57, %v252_v55  ;;  %vm259_vm15 = vweird.f32 %v1333_v57  ;;  %vm308_vm3 = vmor %vm306_vm1, %vm307_vm14 }
 0x493   :  { %v303_v60 = vsub.f32 1.0, %v302_v58  ;;  %vm260_vm4 = vmor %vm258_vm2, %vm259_vm15 }
 0x494   :  { %v255_v61 = vsub.f32 1.0, %v254_v59 }
 0x495   :  { %v304_v0 = vmul.f32 %v1331_v56, %v303_v60 }
 0x496   :  { %v256_v2 = vmul.f32 %v1333_v57, %v255_v61 }
 0x497   :  { %v305_v4 = vadd.f32 %v1331_v56, %v304_v0 }
 0x498   :  { %v257_v5 = vadd.f32 %v1333_v57, %v256_v2 }
 0x499   :  { %v309_v9 = vsel %vm308_vm3, %v1331_v56, %v305_v4 }
 0x49a   :  { %v261_v10 = vsel %vm260_vm4, %v1333_v57, %v257_v5  ;;  %v314_v11 = vsel %vm311_vm5, %v313_v6, %v309_v9 }
 0x49b   :  { %v266_v12 = vsel %vm263_vm7, %v265_v7, %v261_v10  ;;  %v316_v14 = vmul.f32 2.0, %v314_v11  ;;  %v318_v31 = vmul.f32 %v314_v11, %v1539_v8 }
 0x49c   :  { %v268_v15 = vmul.f32 2.0, %v266_v12  ;;  %v270_v25 = vmul.f32 0.0, %v266_v12 }
 0x49d   :  { %v1257_v16 = vadd.f32 -1.0, %v316_v14 }
 0x49e   :  { %v1255_v18 = vadd.f32 -1.0, %v268_v15 }
 0x49f   :  { %320 = vrot.lane.b32.xlu1 %v1257_v16, %s1501_s0 }
 0x4a0   :  { %272 = vrot.lane.b32.xlu0 %v1255_v18, %s1501_s0 }
 0x511   :  { %v321_v19 = vpop.permute.xlu1 %320 }
 0x512   :  { %v273_v22 = vpop.permute.xlu0 %272  ;;  %v323_v23 = vmul.f32 %v321_v19, %v314_v11 }
 0x513   :  { %v275_v24 = vmul.f32 %v273_v22, %v266_v12 }
 0x514   :  { %325 = vrot.lane.b32.xlu1 %v323_v23, %s1502_s1 }
 0x515   :  { %277 = vrot.lane.b32.xlu2 %v275_v24, %s1502_s1 }
 0x56f   :  { %v278_v28 = vpop.permute.xlu2 %277 }
 0x570   :  { %v1613_v29 = vadd.f32 %v278_v28, %v270_v25 }
 0x572   :  { %1334 = vtanh.f32 %v1613_v29 }
 0x578   :  { %v1335_v30 = vpop.eup %1334 }
 0x579   :  { %283 = vrot.lane.b32.xlu2 %v1335_v30, %s1501_s0 }
 0x586   :  { %v326_v32 = vpop.permute.xlu1 %325 }
 0x587   :  { %v1618_v34 = vadd.f32 %v326_v32, %v318_v31 }
 0x589   :  { %1336 = vtanh.f32 %v1618_v34 }
 0x58f   :  { %v1337_v36 = vpop.eup %1336 }
 0x590   :  { %331 = vrot.lane.b32.xlu1 %v1337_v36, %s1501_s0 }
 0x5d3   :  { %v284_v37 = vpop.permute.xlu2 %283 }
 0x5d4   :  { %v1622_v38 = vmul.f32 %v284_v37, %v266_v12 }
 0x5d6   :  { %339 = vrot.lane.b32.xlu0 %v1622_v38, %s1501_s0 }
 0x602   :  { %v332_v40 = vpop.permute.xlu1 %331 }
 0x603   :  { %v334_v41 = vmul.f32 %v332_v40, %v314_v11 }
 0x605   :  { %336 = vrot.lane.b32.xlu2 %v334_v41, %s1502_s1 }
 0x648   :  { %v340_v42 = vpop.permute.xlu0 %339 }
 0x65f   :  { %v337_v8 = vpop.permute.xlu2 %336 }
 0x660   :  { %v342_v43 = vsel %vm117_vm6, %v337_v8, %v340_v42 }
 0x661   :  { %v343_v44 = vpack.c.bf16 %v342_v43, %v342_v43 }
 0x663   :  { %1258 = vmatmul.msk.bf16.vlgmr.msrb.gmra.mxu1 %vm60_vm0, %v343_v44  ;;  %1259 = vmatmul.msk.bf16.vlgmr.msrb.gmra.mxu0 %vm60_vm0, %v343_v44 }
 0x664   :  { %847 = vmatpush.bf16.msrb.mxu1 %v1543_v13  ;;  %860 = vmatpush.bf16.msrb.mxu0 %v1545_v17 }
 0x668   :  { %848 = vmatpush.bf16.msrb.mxu1 %v1548_v20  ;;  %861 = vmatpush.bf16.msrb.mxu0 %v1552_v21 }
 0x66c   :  { %849 = vmatpush.bf16.msrb.mxu1 %v1556_v26  ;;  %862 = vmatpush.bf16.msrb.mxu0 %v1560_v27 }
 0x670   :  { %850 = vmatpush.bf16.msrb.mxu1 %v1568_v33  ;;  %863 = vmatpush.bf16.msrb.mxu0 %v1570_v35 }
 0x6e0   :  { %v356_v45 = vpop.f32.mrf.mxu1  ;;  %v369_v46 = vpop.f32.mrf.mxu0 }
 0x6e1   :  { %v419_v47 = vadd.f32 %v356_v45, %v1533_v51  ;;  %v373_v48 = vadd.f32 %v369_v46, %v1603_v39 }
 0x6e3   :  { %v420_v49 = vmul.f32 %v419_v47, %v1531_v50  ;;  %v374_v52 = vmul.f32 %v373_v48, %v1531_v50 }
 0x6e5   :  { %v1262_v53 = vmul.f32 -1.442695, %v420_v49  ;;  %v1260_v54 = vmul.f32 -1.442695, %v374_v52 }
 0x6e7   :  { %1338 = vpow2.f32 %v1262_v53 }
 0x6e8   :  { %1340 = vpow2.f32 %v1260_v54  ;;  %v358_v55 = vpop.f32.mrf.mxu1  ;;  %v371_v56 = vpop.f32.mrf.mxu0 }
 0x6ed   :  { %v1339_v57 = vpop.eup %1338 }
 0x6ee   :  { %v1341_v58 = vpop.eup %1340  ;;  %v424_v59 = vadd.f32 1.0, %v1339_v57 }
 0x6ef   :  { %v378_v60 = vadd.f32 1.0, %v1341_v58 }
 0x6f0   :  { %1342 = vrcp.f32 %v424_v59  ;;  %v436_v3 = vand.u32 2147483648, %v424_v59  ;;  %v434_v6 = vand.u32 2147483647, %v424_v59  ;;  %vm430_vm10 = vweird.f32 %v424_v59 }
 0x6f1   :  { %1344 = vrcp.f32 %v378_v60  ;;  %v390_v4 = vand.u32 2147483648, %v378_v60  ;;  %v388_v9 = vand.u32 2147483647, %v378_v60  ;;  %vm384_vm11 = vweird.f32 %v378_v60 }
 0x6f2   :  { %v437_v12 = vor.u32 1.1754944e-38, %v436_v3  ;;  %vm435_vm14 = vcmp.eq.f32.partialorder %v434_v6, 8.507059e+37 }
 0x6f3   :  { %v391_v14 = vor.u32 1.1754944e-38, %v390_v4  ;;  %vm389_vm15 = vcmp.eq.f32.partialorder %v388_v9, 8.507059e+37 }
 0x6f6   :  { %v1343_v61 = vpop.eup %1342 }
 0x6f7   :  { %v1345_v62 = vpop.eup %1344  ;;  %v426_v63 = vmul.f32 %v1343_v61, %v424_v59  ;;  %vm431_vm8 = vweird.f32 %v1343_v61 }
 0x6f8   :  { %v380_v0 = vmul.f32 %v1345_v62, %v378_v60  ;;  %vm385_vm9 = vweird.f32 %v1345_v62  ;;  %vm432_vm12 = vmor %vm430_vm10, %vm431_vm8 }
 0x6f9   :  { %v427_v1 = vsub.f32 1.0, %v426_v63  ;;  %vm386_vm13 = vmor %vm384_vm11, %vm385_vm9 }
 0x6fa   :  { %v381_v2 = vsub.f32 1.0, %v380_v0 }
 0x6fb   :  { %v428_v5 = vmul.f32 %v1343_v61, %v427_v1 }
 0x6fc   :  { %v382_v7 = vmul.f32 %v1345_v62, %v381_v2 }
 0x6fd   :  { %v429_v10 = vadd.f32 %v1343_v61, %v428_v5 }
 0x6fe   :  { %v383_v11 = vadd.f32 %v1345_v62, %v382_v7 }
 0x6ff   :  { %v433_v15 = vsel %vm432_vm12, %v1343_v61, %v429_v10 }
 0x700   :  { %v387_v16 = vsel %vm386_vm13, %v1345_v62, %v383_v11  ;;  %v438_v18 = vsel %vm435_vm14, %v437_v12, %v433_v15 }
 0x701   :  { %v392_v19 = vsel %vm389_vm15, %v391_v14, %v387_v16  ;;  %v440_v22 = vmul.f32 2.0, %v438_v18  ;;  %v442_v36 = vmul.f32 %v438_v18, %v1618_v34 }
 0x702   :  { %v394_v23 = vmul.f32 2.0, %v392_v19  ;;  %v396_v42 = vmul.f32 %v392_v19, %v1613_v29 }
 0x703   :  { %v1263_v24 = vadd.f32 -1.0, %v440_v22 }
 0x704   :  { %v1261_v25 = vadd.f32 -1.0, %v394_v23 }
 0x705   :  { %444 = vrot.lane.b32.xlu2 %v1263_v24, %s1501_s0 }
 0x706   :  { %398 = vrot.lane.b32.xlu1 %v1261_v25, %s1501_s0 }
 0x75f   :  { %v445_v28 = vpop.permute.xlu2 %444 }
 0x760   :  { %v447_v30 = vmul.f32 %v445_v28, %v438_v18 }
 0x762   :  { %449 = vrot.lane.b32.xlu1 %v447_v30, %s1502_s1 }
 0x778   :  { %v399_v31 = vpop.permute.xlu1 %398 }
 0x779   :  { %v401_v32 = vmul.f32 %v399_v31, %v392_v19 }
 0x77b   :  { %403 = vrot.lane.b32.xlu0 %v401_v32, %s1502_s1 }
 0x7d4   :  { %v450_v37 = vpop.permute.xlu1 %449 }
 0x7d5   :  { %v1647_v40 = vadd.f32 %v450_v37, %v442_v36 }
 0x7d7   :  { %1346 = vtanh.f32 %v1647_v40 }
 0x7dd   :  { %v1347_v41 = vpop.eup %1346 }
 0x7de   :  { %455 = vrot.lane.b32.xlu0 %v1347_v41, %s1501_s0 }
 0x7ed   :  { %v404_v8 = vpop.permute.xlu0 %403 }
 0x7ee   :  { %v1652_v43 = vadd.f32 %v404_v8, %v396_v42 }
 0x7f0   :  { %1348 = vtanh.f32 %v1652_v43 }
 0x7f6   :  { %v1349_v44 = vpop.eup %1348 }
 0x7f7   :  { %409 = vrot.lane.b32.xlu2 %v1349_v44, %s1501_s0 }
 0x850   :  { %v456_v45 = vpop.permute.xlu0 %455 }
 0x851   :  { %v458_v34 = vmul.f32 %v456_v45, %v438_v18  ;;  %v410_v46 = vpop.permute.xlu2 %409 }
 0x852   :  { %v1656_v47 = vmul.f32 %v410_v46, %v392_v19 }
 0x853   :  { %460 = vrot.lane.b32.xlu1 %v458_v34, %s1502_s1 }
 0x854   :  { %463 = vrot.lane.b32.xlu2 %v1656_v47, %s1501_s0 }
 0x8ae   :  { %v464_v48 = vpop.permute.xlu2 %463 }
 0x8c5   :  { %v461_v29 = vpop.permute.xlu1 %460 }
 0x8c6   :  { %v466_v49 = vsel %vm117_vm6, %v461_v29, %v464_v48 }
 0x8c7   :  { %v467_v52 = vpack.c.bf16 %v466_v49, %v466_v49 }
 0x8c9   :  { %1264 = vmatmul.msk.bf16.vlgmr.msrb.gmra.mxu2 %vm60_vm0, %v467_v52  ;;  %1265 = vmatmul.msk.bf16.vlgmr.msrb.gmra.mxu3 %vm60_vm0, %v467_v52 }
 0x8ca   :  { %984 = vmatpush.bf16.msrb.mxu3 %v1545_v17  ;;  %971 = vmatpush.bf16.msrb.mxu2 %v1543_v13 }
 0x8ce   :  { %985 = vmatpush.bf16.msrb.mxu3 %v1552_v21  ;;  %972 = vmatpush.bf16.msrb.mxu2 %v1548_v20 }
 0x8d2   :  { %986 = vmatpush.bf16.msrb.mxu3 %v1560_v27  ;;  %973 = vmatpush.bf16.msrb.mxu2 %v1556_v26 }
 0x8d6   :  { %987 = vmatpush.bf16.msrb.mxu3 %v1570_v35  ;;  %974 = vmatpush.bf16.msrb.mxu2 %v1568_v33 }
 0x94c   :  { %v480_v53 = vpop.f32.mrf.mxu2  ;;  %v493_v54 = vpop.f32.mrf.mxu3 }
 0x94d   :  { %v543_v55 = vadd.f32 %v480_v53, %v1533_v51  ;;  %v497_v56 = vadd.f32 %v493_v54, %v1603_v39 }
 0x94f   :  { %v544_v13 = vmul.f32 %v543_v55, %v1531_v50  ;;  %v498_v57 = vmul.f32 %v497_v56, %v1531_v50 }
 0x951   :  { %v1268_v58 = vmul.f32 -1.442695, %v544_v13  ;;  %v1266_v20 = vmul.f32 -1.442695, %v498_v57 }
 0x953   :  { %1350 = vpow2.f32 %v1268_v58 }
 0x954   :  { %1352 = vpow2.f32 %v1266_v20  ;;  %v482_v59 = vpop.f32.mrf.mxu2  ;;  %v495_v26 = vpop.f32.mrf.mxu3 }
 0x959   :  { %v1351_v60 = vpop.eup %1350 }
 0x95a   :  { %v1353_v61 = vpop.eup %1352  ;;  %v548_v62 = vadd.f32 1.0, %v1351_v60 }
 0x95b   :  { %v502_v33 = vadd.f32 1.0, %v1353_v61 }
 0x95c   :  { %1354 = vrcp.f32 %v548_v62  ;;  %v560_v5 = vand.u32 2147483648, %v548_v62  ;;  %v558_v9 = vand.u32 2147483647, %v548_v62  ;;  %vm554_vm3 = vweird.f32 %v548_v62 }
 0x95d   :  { %1356 = vrcp.f32 %v502_v33  ;;  %v514_v6 = vand.u32 2147483648, %v502_v33  ;;  %v512_v11 = vand.u32 2147483647, %v502_v33  ;;  %vm508_vm4 = vweird.f32 %v502_v33 }
 0x95e   :  { %v561_v15 = vor.u32 1.1754944e-38, %v560_v5  ;;  %vm559_vm8 = vcmp.eq.f32.partialorder %v558_v9, 8.507059e+37 }
 0x95f   :  { %v515_v16 = vor.u32 1.1754944e-38, %v514_v6  ;;  %vm513_vm9 = vcmp.eq.f32.partialorder %v512_v11, 8.507059e+37 }
 0x962   :  { %v1355_v63 = vpop.eup %1354 }
 0x963   :  { %v1357_v0 = vpop.eup %1356  ;;  %v550_v1 = vmul.f32 %v1355_v63, %v548_v62  ;;  %vm555_vm1 = vweird.f32 %v1355_v63 }
 0x964   :  { %v504_v2 = vmul.f32 %v1357_v0, %v502_v33  ;;  %vm509_vm2 = vweird.f32 %v1357_v0  ;;  %vm556_vm5 = vmor %vm554_vm3, %vm555_vm1 }
 0x965   :  { %v551_v3 = vsub.f32 1.0, %v550_v1  ;;  %vm510_vm7 = vmor %vm508_vm4, %vm509_vm2 }
 0x966   :  { %v505_v4 = vsub.f32 1.0, %v504_v2 }
 0x967   :  { %v552_v7 = vmul.f32 %v1355_v63, %v551_v3 }
 0x968   :  { %v506_v10 = vmul.f32 %v1357_v0, %v505_v4 }
 0x969   :  { %v553_v12 = vadd.f32 %v1355_v63, %v552_v7 }
 0x96a   :  { %v507_v14 = vadd.f32 %v1357_v0, %v506_v10 }
 0x96b   :  { %v557_v18 = vsel %vm556_vm5, %v1355_v63, %v553_v12 }
 0x96c   :  { %v511_v19 = vsel %vm510_vm7, %v1357_v0, %v507_v14  ;;  %v562_v22 = vsel %vm559_vm8, %v561_v15, %v557_v18 }
 0x96d   :  { %v516_v23 = vsel %vm513_vm9, %v515_v16, %v511_v19  ;;  %v564_v24 = vmul.f32 2.0, %v562_v22  ;;  %v566_v45 = vmul.f32 %v562_v22, %v1647_v40 }
 0x96e   :  { %v518_v25 = vmul.f32 2.0, %v516_v23  ;;  %v520_v41 = vmul.f32 %v516_v23, %v1652_v43 }
 0x96f   :  { %v1269_v28 = vadd.f32 -1.0, %v564_v24 }
 0x970   :  { %v1267_v30 = vadd.f32 -1.0, %v518_v25 }
 0x971   :  { %568 = vrot.lane.b32.xlu1 %v1269_v28, %s1501_s0 }
 0x972   :  { %522 = vrot.lane.b32.xlu0 %v1267_v30, %s1501_s0 }
 0x9e3   :  { %v569_v31 = vpop.permute.xlu1 %568 }
 0x9e4   :  { %v523_v32 = vpop.permute.xlu0 %522  ;;  %v571_v36 = vmul.f32 %v569_v31, %v562_v22 }
 0x9e5   :  { %v525_v37 = vmul.f32 %v523_v32, %v516_v23 }
 0x9e6   :  { %573 = vrot.lane.b32.xlu0 %v571_v36, %s1502_s1 }
 0x9e7   :  { %527 = vrot.lane.b32.xlu2 %v525_v37, %s1502_s1 }
 0xa41   :  { %v528_v42 = vpop.permute.xlu2 %527 }
 0xa42   :  { %v1681_v8 = vadd.f32 %v528_v42, %v520_v41 }
 0xa44   :  { %1358 = vtanh.f32 %v1681_v8 }
 0xa4a   :  { %v1359_v44 = vpop.eup %1358 }
 0xa4b   :  { %533 = vrot.lane.b32.xlu1 %v1359_v44, %s1501_s0 }
 0xa58   :  { %v574_v34 = vpop.permute.xlu0 %573 }
 0xa59   :  { %v1686_v46 = vadd.f32 %v574_v34, %v566_v45 }
 0xa5b   :  { %1360 = vtanh.f32 %v1686_v46 }
 0xa61   :  { %v1361_v48 = vpop.eup %1360 }
 0xa62   :  { %579 = vrot.lane.b32.xlu2 %v1361_v48, %s1501_s0 }
 0xabc   :  { %v580_v29 = vpop.permute.xlu2 %579 }
 0xabd   :  { %v582_v43 = vmul.f32 %v580_v29, %v562_v22  ;;  %v534_v49 = vpop.permute.xlu1 %533 }
 0xabe   :  { %v1690_v52 = vmul.f32 %v534_v49, %v516_v23 }
 0xabf   :  { %584 = vrot.lane.b32.xlu0 %v582_v43, %s1502_s1 }
 0xac0   :  { %587 = vrot.lane.b32.xlu1 %v1690_v52, %s1501_s0 }
 0xb31   :  { %v585_v53 = vpop.permute.xlu0 %584 }
 0xb32   :  { %v588_v40 = vpop.permute.xlu1 %587 }
 0xb33   :  { %v590_v54 = vsel %vm117_vm6, %v585_v53, %v588_v40 }
 0xb34   :  { %v591_v55 = vpack.c.bf16 %v590_v54, %v590_v54 }
 0xb36   :  { %1270 = vmatmul.msk.bf16.vlgmr.msra.gmra.mxu1 %vm60_vm0, %v591_v55  ;;  %1271 = vmatmul.msk.bf16.vlgmr.msra.gmra.mxu0 %vm60_vm0, %v591_v55 }
 0xb37   :  { %1095 = vmatpush.bf16.msra.mxu1 %v1545_v17 }
 0xb3b   :  { %1096 = vmatpush.bf16.msra.mxu1 %v1552_v21 }
 0xb3f   :  { %1097 = vmatpush.bf16.msra.mxu1 %v1560_v27 }
 0xb43   :  { %1098 = vmatpush.bf16.msra.mxu1 %v1570_v35 }
 0xbb3   :  { %v604_v56 = vpop.f32.mrf.mxu1  ;;  %v617_v13 = vpop.f32.mrf.mxu0 }
 0xbb4   :  { %v667_v57 = vadd.f32 %v604_v56, %v1533_v51  ;;  %v621_v58 = vadd.f32 %v617_v13, %v1603_v39 }
 0xbb6   :  { %v668_v20 = vmul.f32 %v667_v57, %v1531_v50  ;;  %v622_v59 = vmul.f32 %v621_v58, %v1531_v50 }
 0xbb8   :  { %v1274_v26 = vmul.f32 -1.442695, %v668_v20  ;;  %v1272_v60 = vmul.f32 -1.442695, %v622_v59 }
 0xbba   :  { %1362 = vpow2.f32 %v1274_v26 }
 0xbbb   :  { %1364 = vpow2.f32 %v1272_v60  ;;  %v606_v17 = vpop.f32.mrf.mxu1  ;;  %v619_v21 = vpop.f32.mrf.mxu0 }
 0xbc0   :  { %v1363_v61 = vpop.eup %1362 }
 0xbc1   :  { %v1365_v27 = vpop.eup %1364  ;;  %v672_v62 = vadd.f32 1.0, %v1363_v61 }
 0xbc2   :  { %v626_v35 = vadd.f32 1.0, %v1365_v27 }
 0xbc3   :  { %1366 = vrcp.f32 %v672_v62  ;;  %v684_v4 = vand.u32 2147483648, %v672_v62  ;;  %v682_v7 = vand.u32 2147483647, %v672_v62  ;;  %vm678_vm12 = vweird.f32 %v672_v62 }
 0xbc4   :  { %1368 = vrcp.f32 %v626_v35  ;;  %v638_v5 = vand.u32 2147483648, %v626_v35  ;;  %v636_v10 = vand.u32 2147483647, %v626_v35  ;;  %vm632_vm13 = vweird.f32 %v626_v35 }
 0xbc5   :  { %v685_v14 = vor.u32 1.1754944e-38, %v684_v4  ;;  %vm683_vm1 = vcmp.eq.f32.partialorder %v682_v7, 8.507059e+37 }
 0xbc6   :  { %v639_v15 = vor.u32 1.1754944e-38, %v638_v5  ;;  %vm637_vm2 = vcmp.eq.f32.partialorder %v636_v10, 8.507059e+37 }
 0xbc9   :  { %v1367_v33 = vpop.eup %1366 }
 0xbca   :  { %v1369_v63 = vpop.eup %1368  ;;  %v674_v0 = vmul.f32 %v1367_v33, %v672_v62  ;;  %vm679_vm10 = vweird.f32 %v1367_v33 }
 0xbcb   :  { %v628_v1 = vmul.f32 %v1369_v63, %v626_v35  ;;  %vm633_vm11 = vweird.f32 %v1369_v63  ;;  %vm680_vm14 = vmor %vm678_vm12, %vm679_vm10 }
 0xbcc   :  { %v675_v2 = vsub.f32 1.0, %v674_v0  ;;  %vm634_vm15 = vmor %vm632_vm13, %vm633_vm11 }
 0xbcd   :  { %v629_v3 = vsub.f32 1.0, %v628_v1 }
 0xbce   :  { %v676_v6 = vmul.f32 %v1367_v33, %v675_v2 }
 0xbcf   :  { %v630_v9 = vmul.f32 %v1369_v63, %v629_v3 }
 0xbd0   :  { %v677_v11 = vadd.f32 %v1367_v33, %v676_v6 }
 0xbd1   :  { %v631_v12 = vadd.f32 %v1369_v63, %v630_v9 }
 0xbd2   :  { %v681_v16 = vsel %vm680_vm14, %v1367_v33, %v677_v11 }
 0xbd3   :  { %v635_v18 = vsel %vm634_vm15, %v1369_v63, %v631_v12  ;;  %v686_v19 = vsel %vm683_vm1, %v685_v14, %v681_v16 }
 0xbd4   :  { %v640_v22 = vsel %vm637_vm2, %v639_v15, %v635_v18  ;;  %v688_v23 = vmul.f32 2.0, %v686_v19  ;;  %v690_v37 = vmul.f32 %v686_v19, %v1686_v46 }
 0xbd5   :  { %v642_v24 = vmul.f32 2.0, %v640_v22  ;;  %v644_v41 = vmul.f32 %v640_v22, %v1681_v8 }
 0xbd6   :  { %v1275_v25 = vadd.f32 -1.0, %v688_v23 }
 0xbd7   :  { %v1273_v28 = vadd.f32 -1.0, %v642_v24 }
 0xbd8   :  { %692 = vrot.lane.b32.xlu0 %v1275_v25, %s1501_s0 }
 0xbd9   :  { %646 = vrot.lane.b32.xlu2 %v1273_v28, %s1501_s0 }
 0xc33   :  { %v647_v30 = vpop.permute.xlu2 %646 }
 0xc34   :  { %v649_v31 = vmul.f32 %v647_v30, %v640_v22 }
 0xc36   :  { %651 = vrot.lane.b32.xlu1 %v649_v31, %s1502_s1 }
 0xc4a   :  { %v693_v32 = vpop.permute.xlu0 %692 }
 0xc4b   :  { %v695_v36 = vmul.f32 %v693_v32, %v686_v19 }
 0xc4d   :  { %697 = vrot.lane.b32.xlu2 %v695_v36, %s1502_s1 }
 0xca7   :  { %v698_v42 = vpop.permute.xlu2 %697 }
 0xca8   :  { %v652_v44 = vpop.permute.xlu1 %651  ;;  %v1712_v45 = vadd.f32 %v698_v42, %v690_v37 }
 0xca9   :  { %v1714_v34 = vadd.f32 %v652_v44, %v644_v41 }
 0xcaa   :  { %1370 = vtanh.f32 %v1712_v45 }
 0xcab   :  { %1372 = vtanh.f32 %v1714_v34 }
 0xcb0   :  { %v1371_v48 = vpop.eup %1370 }
 0xcb1   :  { %v1373_v29 = vpop.eup %1372  ;;  %703 = vrot.lane.b32.xlu1 %v1371_v48, %s1501_s0 }
 0xcb2   :  { %657 = vrot.lane.b32.xlu0 %v1373_v29, %s1501_s0 }
 0xd23   :  { %v704_v43 = vpop.permute.xlu1 %703 }
 0xd24   :  { %v706_v46 = vmul.f32 %v704_v43, %v686_v19  ;;  %v658_v49 = vpop.permute.xlu0 %657 }
 0xd25   :  { %v1720_v8 = vmul.f32 %v658_v49, %v640_v22 }
 0xd26   :  { %708 = vrot.lane.b32.xlu2 %v706_v46, %s1502_s1 }
 0xd27   :  { %711 = vrot.lane.b32.xlu0 %v1720_v8, %s1501_s0 }
 0xd80   :  { %v709_v53 = vpop.permute.xlu2 %708 }
 0xd99   :  { %v712_v40 = vpop.permute.xlu0 %711 }
 0xd9a   :  { %v714_v54 = vsel %vm117_vm6, %v709_v53, %v712_v40 }
 0xd9b   :  { %v715_v55 = vpack.c.bf16 %v714_v54, %v714_v54 }
 0xd9d   :  { %1276 = vmatmul.msk.bf16.vlgmr.msra.gmra.mxu2 %vm60_vm0, %v715_v55  ;;  %1277 = vmatmul.msk.bf16.vlgmr.msra.gmra.mxu3 %vm60_vm0, %v715_v55 }
 0xe20   :  { %v728_v56 = vpop.f32.mrf.mxu2  ;;  %v741_v13 = vpop.f32.mrf.mxu3 }
 0xe21   :  { %v791_v57 = vadd.f32 %v728_v56, %v1533_v51  ;;  %v745_v58 = vadd.f32 %v741_v13, %v1603_v39 }
 0xe23   :  { %v792_v20 = vmul.f32 %v791_v57, %v1531_v50  ;;  %v746_v59 = vmul.f32 %v745_v58, %v1531_v50 }
 0xe25   :  { %v1280_v26 = vmul.f32 -1.442695, %v792_v20  ;;  %v1278_v60 = vmul.f32 -1.442695, %v746_v59 }
 0xe27   :  { %1374 = vpow2.f32 %v1280_v26 }
 0xe28   :  { %1376 = vpow2.f32 %v1278_v60  ;;  %v730_v17 = vpop.f32.mrf.mxu2  ;;  %v743_v21 = vpop.f32.mrf.mxu3 }
 0xe2d   :  { %v1375_v61 = vpop.eup %1374 }
 0xe2e   :  { %v1377_v27 = vpop.eup %1376  ;;  %v796_v62 = vadd.f32 1.0, %v1375_v61 }
 0xe2f   :  { %v750_v35 = vadd.f32 1.0, %v1377_v27 }
 0xe30   :  { %1378 = vrcp.f32 %v796_v62  ;;  %v808_v4 = vand.u32 2147483648, %v796_v62  ;;  %v806_v7 = vand.u32 2147483647, %v796_v62  ;;  %vm802_vm5 = vweird.f32 %v796_v62 }
 0xe31   :  { %1380 = vrcp.f32 %v750_v35  ;;  %v762_v5 = vand.u32 2147483648, %v750_v35  ;;  %v760_v10 = vand.u32 2147483647, %v750_v35  ;;  %vm756_vm7 = vweird.f32 %v750_v35 }
 0xe32   :  { %v809_v14 = vor.u32 1.1754944e-38, %v808_v4  ;;  %vm807_vm10 = vcmp.eq.f32.partialorder %v806_v7, 8.507059e+37 }
 0xe33   :  { %v763_v15 = vor.u32 1.1754944e-38, %v762_v5  ;;  %vm761_vm11 = vcmp.eq.f32.partialorder %v760_v10, 8.507059e+37 }
 0xe36   :  { %v1379_v33 = vpop.eup %1378 }
 0xe37   :  { %v1381_v63 = vpop.eup %1380  ;;  %v798_v0 = vmul.f32 %v1379_v33, %v796_v62  ;;  %vm803_vm3 = vweird.f32 %v1379_v33 }
 0xe38   :  { %v752_v1 = vmul.f32 %v1381_v63, %v750_v35  ;;  %vm757_vm4 = vweird.f32 %v1381_v63  ;;  %vm804_vm8 = vmor %vm802_vm5, %vm803_vm3 }
 0xe39   :  { %v799_v2 = vsub.f32 1.0, %v798_v0  ;;  %vm758_vm9 = vmor %vm756_vm7, %vm757_vm4 }
 0xe3a   :  { %v753_v3 = vsub.f32 1.0, %v752_v1 }
 0xe3b   :  { %v800_v6 = vmul.f32 %v1379_v33, %v799_v2 }
 0xe3c   :  { %v754_v9 = vmul.f32 %v1381_v63, %v753_v3 }
 0xe3d   :  { %v801_v11 = vadd.f32 %v1379_v33, %v800_v6 }
 0xe3e   :  { %v755_v12 = vadd.f32 %v1381_v63, %v754_v9 }
 0xe3f   :  { %v805_v16 = vsel %vm804_vm8, %v1379_v33, %v801_v11 }
 0xe40   :  { %v759_v18 = vsel %vm758_vm9, %v1381_v63, %v755_v12  ;;  %v810_v19 = vsel %vm807_vm10, %v809_v14, %v805_v16 }
 0xe41   :  { %v764_v22 = vsel %vm761_vm11, %v763_v15, %v759_v18  ;;  %v812_v23 = vmul.f32 2.0, %v810_v19  ;;  %v814_v37 = vmul.f32 %v810_v19, %v1712_v45 }
 0xe42   :  { %v766_v24 = vmul.f32 2.0, %v764_v22  ;;  %v768_v48 = vmul.f32 %v764_v22, %v1714_v34 }
 0xe43   :  { %v1281_v25 = vadd.f32 -1.0, %v812_v23 }
 0xe44   :  { %v1279_v28 = vadd.f32 -1.0, %v766_v24 }
 0xe45   :  { %816 = vrot.lane.b32.xlu2 %v1281_v25, %s1501_s0 }
 0xe46   :  { %770 = vrot.lane.b32.xlu1 %v1279_v28, %s1501_s0 }
 0xe9f   :  { %v817_v30 = vpop.permute.xlu2 %816 }
 0xea0   :  { %v819_v31 = vmul.f32 %v817_v30, %v810_v19 }
 0xea2   :  { %821 = vrot.lane.b32.xlu1 %v819_v31, %s1502_s1 }
 0xeb8   :  { %v771_v32 = vpop.permute.xlu1 %770 }
 0xeb9   :  { %v773_v36 = vmul.f32 %v771_v32, %v764_v22 }
 0xebb   :  { %775 = vrot.lane.b32.xlu0 %v773_v36, %s1502_s1 }
 0xf14   :  { %v822_v41 = vpop.permute.xlu1 %821 }
 0xf15   :  { %v1737_v42 = vadd.f32 %v822_v41, %v814_v37 }
 0xf17   :  { %1382 = vtanh.f32 %v1737_v42 }
 0xf1d   :  { %v1383_v44 = vpop.eup %1382 }
 0xf1e   :  { %827 = vrot.lane.b32.xlu0 %v1383_v44, %s1501_s0 }
 0xf2d   :  { %v776_v29 = vpop.permute.xlu0 %775 }
 0xf2e   :  { %v1742_v43 = vadd.f32 %v776_v29, %v768_v48 }
 0xf30   :  { %1384 = vtanh.f32 %v1742_v43 }
 0xf36   :  { %v1385_v46 = vpop.eup %1384 }
 0xf37   :  { %781 = vrot.lane.b32.xlu2 %v1385_v46, %s1501_s0 }
 0xf90   :  { %v828_v49 = vpop.permute.xlu0 %827 }
 0xf91   :  { %v830_v45 = vmul.f32 %v828_v49, %v810_v19  ;;  %v782_v53 = vpop.permute.xlu2 %781 }
 0xf92   :  { %v1746_v40 = vmul.f32 %v782_v53, %v764_v22 }
 0xf93   :  { %832 = vrot.lane.b32.xlu1 %v830_v45, %s1502_s1 }
 0xf94   :  { %835 = vrot.lane.b32.xlu2 %v1746_v40, %s1501_s0 }
 0xfee   :  { %v836_v54 = vpop.permute.xlu2 %835 }
0x1005   :  { %v833_v34 = vpop.permute.xlu1 %832 }
0x1006   :  { %v838_v55 = vsel %vm117_vm6, %v833_v34, %v836_v54 }
0x1007   :  { %v839_v56 = vpack.c.bf16 %v838_v55, %v838_v55 }
0x1009   :  { %1282 = vmatmul.msk.bf16.vlgmr.msrb.gmra.mxu1 %vm60_vm0, %v839_v56  ;;  %1283 = vmatmul.msk.bf16.vlgmr.msrb.gmra.mxu0 %vm60_vm0, %v839_v56 }
0x1086   :  { %v852_v13 = vpop.f32.mrf.mxu1  ;;  %v865_v57 = vpop.f32.mrf.mxu0 }
0x1087   :  { %v915_v58 = vadd.f32 %v852_v13, %v1533_v51  ;;  %v869_v20 = vadd.f32 %v865_v57, %v1603_v39 }
0x1089   :  { %v916_v59 = vmul.f32 %v915_v58, %v1531_v50  ;;  %v870_v26 = vmul.f32 %v869_v20, %v1531_v50 }
0x108b   :  { %v1286_v60 = vmul.f32 -1.442695, %v916_v59  ;;  %v1284_v17 = vmul.f32 -1.442695, %v870_v26  ;;  %v1781_v59 = vld [vmem:[#allocation6 + $0x104] ss:$0 sm:$0xff] }
0x108d   :  { %1386 = vpow2.f32 %v1286_v60 }
0x108e   :  { %1388 = vpow2.f32 %v1284_v17  ;;  %v854_v21 = vpop.f32.mrf.mxu1  ;;  %v867_v61 = vpop.f32.mrf.mxu0 }
0x1093   :  { %v1387_v27 = vpop.eup %1386 }
0x1094   :  { %v1389_v62 = vpop.eup %1388  ;;  %v920_v35 = vadd.f32 1.0, %v1387_v27 }
0x1095   :  { %v874_v33 = vadd.f32 1.0, %v1389_v62 }
0x1096   :  { %1390 = vrcp.f32 %v920_v35  ;;  %v932_v4 = vand.u32 2147483648, %v920_v35  ;;  %v930_v7 = vand.u32 2147483647, %v920_v35  ;;  %vm926_vm14 = vweird.f32 %v920_v35 }
0x1097   :  { %1392 = vrcp.f32 %v874_v33  ;;  %v886_v5 = vand.u32 2147483648, %v874_v33  ;;  %v884_v10 = vand.u32 2147483647, %v874_v33  ;;  %vm880_vm15 = vweird.f32 %v874_v33 }
0x1098   :  { %v933_v14 = vor.u32 1.1754944e-38, %v932_v4  ;;  %vm931_vm3 = vcmp.eq.f32.partialorder %v930_v7, 8.507059e+37 }
0x1099   :  { %v887_v15 = vor.u32 1.1754944e-38, %v886_v5  ;;  %vm885_vm4 = vcmp.eq.f32.partialorder %v884_v10, 8.507059e+37 }
0x109c   :  { %v1391_v63 = vpop.eup %1390 }
0x109d   :  { %v1393_v0 = vpop.eup %1392  ;;  %v922_v1 = vmul.f32 %v1391_v63, %v920_v35  ;;  %vm927_vm12 = vweird.f32 %v1391_v63 }
0x109e   :  { %v876_v39 = vmul.f32 %v1393_v0, %v874_v33  ;;  %vm881_vm13 = vweird.f32 %v1393_v0  ;;  %vm928_vm1 = vmor %vm926_vm14, %vm927_vm12 }
0x109f   :  { %v923_v2 = vsub.f32 1.0, %v922_v1  ;;  %vm882_vm2 = vmor %vm880_vm15, %vm881_vm13 }
0x10a0   :  { %v877_v3 = vsub.f32 1.0, %v876_v39 }
0x10a1   :  { %v924_v6 = vmul.f32 %v1391_v63, %v923_v2 }
0x10a2   :  { %v878_v9 = vmul.f32 %v1393_v0, %v877_v3 }
0x10a3   :  { %v925_v11 = vadd.f32 %v1391_v63, %v924_v6 }
0x10a4   :  { %v879_v12 = vadd.f32 %v1393_v0, %v878_v9 }
0x10a5   :  { %v929_v16 = vsel %vm928_vm1, %v1391_v63, %v925_v11 }
0x10a6   :  { %v883_v18 = vsel %vm882_vm2, %v1393_v0, %v879_v12  ;;  %v934_v19 = vsel %vm931_vm3, %v933_v14, %v929_v16  ;;  %vm291_vm3 = vcmask 253952  }
0x10a7   :  { %v888_v22 = vsel %vm885_vm4, %v887_v15, %v883_v18  ;;  %v936_v23 = vmul.f32 2.0, %v934_v19  ;;  %v938_v29 = vmul.f32 %v934_v19, %v1737_v42  ;;  %vm293_vm4 = vcmask 254977  }
0x10a8   :  { %v890_v24 = vmul.f32 2.0, %v888_v22  ;;  %v892_v37 = vmul.f32 %v888_v22, %v1742_v43 }
0x10a9   :  { %v1287_v25 = vadd.f32 -1.0, %v936_v23 }
0x10aa   :  { %v1285_v28 = vadd.f32 -1.0, %v890_v24 }
0x10ab   :  { %940 = vrot.lane.b32.xlu1 %v1287_v25, %s1501_s0 }
0x10ac   :  { %894 = vrot.lane.b32.xlu0 %v1285_v28, %s1501_s0 }
0x111d   :  { %v941_v30 = vpop.permute.xlu1 %940 }
0x111e   :  { %v895_v31 = vpop.permute.xlu0 %894  ;;  %v943_v32 = vmul.f32 %v941_v30, %v934_v19 }
0x111f   :  { %v897_v36 = vmul.f32 %v895_v31, %v888_v22 }
0x1120   :  { %945 = vrot.lane.b32.xlu0 %v943_v32, %s1502_s1 }
0x1121   :  { %899 = vrot.lane.b32.xlu2 %v897_v36, %s1502_s1 }
0x117b   :  { %v900_v41 = vpop.permute.xlu2 %899 }
0x117c   :  { %v1763_v44 = vadd.f32 %v900_v41, %v892_v37 }
0x117e   :  { %1394 = vtanh.f32 %v1763_v44 }
0x1184   :  { %v1395_v48 = vpop.eup %1394 }
0x1185   :  { %905 = vrot.lane.b32.xlu1 %v1395_v48, %s1501_s0 }
0x1192   :  { %v946_v46 = vpop.permute.xlu0 %945 }
0x1193   :  { %v1768_v49 = vadd.f32 %v946_v46, %v938_v29 }
0x1195   :  { %1396 = vtanh.f32 %v1768_v49 }
0x119b   :  { %v1397_v45 = vpop.eup %1396 }
0x119c   :  { %951 = vrot.lane.b32.xlu2 %v1397_v45, %s1501_s0 }
0x11f6   :  { %v952_v53 = vpop.permute.xlu2 %951 }
0x11f7   :  { %v954_v43 = vmul.f32 %v952_v53, %v934_v19  ;;  %v906_v54 = vpop.permute.xlu1 %905 }
0x11f8   :  { %v1772_v34 = vmul.f32 %v906_v54, %v888_v22 }
0x11f9   :  { %956 = vrot.lane.b32.xlu0 %v954_v43, %s1502_s1 }
0x11fa   :  { %959 = vrot.lane.b32.xlu1 %v1772_v34, %s1501_s0 }
0x126b   :  { %v957_v55 = vpop.permute.xlu0 %956 }
0x126c   :  { %v960_v42 = vpop.permute.xlu1 %959 }
0x126d   :  { %v962_v56 = vsel %vm117_vm6, %v957_v55, %v960_v42 }
0x126e   :  { %v963_v13 = vpack.c.bf16 %v962_v56, %v962_v56 }
0x1270   :  { %1288 = vmatmul.msk.bf16.vlgmr.msrb.gmra.mxu2 %vm60_vm0, %v963_v13  ;;  %1289 = vmatmul.msk.bf16.vlgmr.msrb.gmra.mxu3 %vm60_vm0, %v963_v13 }
0x12f3   :  { %v976_v57 = vpop.f32.mrf.mxu2  ;;  %v989_v58 = vpop.f32.mrf.mxu3 }
0x12f4   :  { %v1039_v20 = vadd.f32 %v976_v57, %v1533_v51  ;;  %v993_v26 = vadd.f32 %v1781_v59, %v989_v58 }
0x12f6   :  { %v1040_v60 = vmul.f32 %v1039_v20, %v1531_v50  ;;  %v994_v17 = vmul.f32 %v993_v26, %v1531_v50 }
0x12f8   :  { %v1292_v21 = vmul.f32 -1.442695, %v1040_v60  ;;  %v1290_v61 = vmul.f32 -1.442695, %v994_v17 }
0x12fa   :  { %1398 = vpow2.f32 %v1292_v21 }
0x12fb   :  { %1400 = vpow2.f32 %v1290_v61  ;;  %v978_v27 = vpop.f32.mrf.mxu2  ;;  %v991_v62 = vpop.f32.mrf.mxu3 }
0x1300   :  { %v1399_v35 = vpop.eup %1398 }
0x1301   :  { %v1401_v33 = vpop.eup %1400  ;;  %v1044_v63 = vadd.f32 1.0, %v1399_v35 }
0x1302   :  { %v998_v0 = vadd.f32 1.0, %v1401_v33 }
0x1303   :  { %1402 = vrcp.f32 %v1044_v63  ;;  %v1056_v5 = vand.u32 2147483648, %v1044_v63  ;;  %v1054_v9 = vand.u32 2147483647, %v1044_v63  ;;  %vm1050_vm8 = vweird.f32 %v1044_v63 }
0x1304   :  { %1404 = vrcp.f32 %v998_v0  ;;  %v1010_v6 = vand.u32 2147483648, %v998_v0  ;;  %v1008_v11 = vand.u32 2147483647, %v998_v0  ;;  %vm1004_vm9 = vweird.f32 %v998_v0 }
0x1305   :  { %v1057_v15 = vor.u32 1.1754944e-38, %v1056_v5  ;;  %vm1055_vm12 = vcmp.eq.f32.partialorder %v1054_v9, 8.507059e+37 }
0x1306   :  { %v1011_v16 = vor.u32 1.1754944e-38, %v1010_v6  ;;  %vm1009_vm13 = vcmp.eq.f32.partialorder %v1008_v11, 8.507059e+37 }
0x1309   :  { %v1403_v51 = vpop.eup %1402 }
0x130a   :  { %v1405_v1 = vpop.eup %1404  ;;  %v1046_v39 = vmul.f32 %v1403_v51, %v1044_v63  ;;  %vm1051_vm5 = vweird.f32 %v1403_v51 }
0x130b   :  { %v1000_v2 = vmul.f32 %v1405_v1, %v998_v0  ;;  %vm1005_vm7 = vweird.f32 %v1405_v1  ;;  %vm1052_vm10 = vmor %vm1050_vm8, %vm1051_vm5 }
0x130c   :  { %v1047_v3 = vsub.f32 1.0, %v1046_v39  ;;  %vm1006_vm11 = vmor %vm1004_vm9, %vm1005_vm7 }
0x130d   :  { %v1001_v4 = vsub.f32 1.0, %v1000_v2 }
0x130e   :  { %v1048_v7 = vmul.f32 %v1403_v51, %v1047_v3 }
0x130f   :  { %v1002_v10 = vmul.f32 %v1405_v1, %v1001_v4 }
0x1310   :  { %v1049_v12 = vadd.f32 %v1403_v51, %v1048_v7 }
0x1311   :  { %v1003_v14 = vadd.f32 %v1405_v1, %v1002_v10 }
0x1312   :  { %v1053_v18 = vsel %vm1052_vm10, %v1403_v51, %v1049_v12 }
0x1313   :  { %v1007_v19 = vsel %vm1006_vm11, %v1405_v1, %v1003_v14  ;;  %v1058_v22 = vsel %vm1055_vm12, %v1057_v15, %v1053_v18  ;;  %v1154_v14 = vld [vmem:[#allocation6 + $0x170] sm:$0xff] }
0x1314   :  { %v1012_v23 = vsel %vm1009_vm13, %v1011_v16, %v1007_v19  ;;  %v1060_v24 = vmul.f32 2.0, %v1058_v22  ;;  %v1062_v41 = vmul.f32 %v1058_v22, %v1768_v49 }
0x1315   :  { %v1014_v25 = vmul.f32 2.0, %v1012_v23  ;;  %v1016_v48 = vmul.f32 %v1012_v23, %v1763_v44 }
0x1316   :  { %v1293_v28 = vadd.f32 -1.0, %v1060_v24  ;;  %v1162_v24 = vld [vmem:[#allocation6 + $0x1e0] sm:$0xff] }
0x1317   :  { %v1291_v30 = vadd.f32 -1.0, %v1014_v25  ;;  %v1161_v25 = vld [vmem:[#allocation6 + $0x1d0] sm:$0xff] }
0x1318   :  { %1064 = vrot.lane.b32.xlu0 %v1293_v28, %s1501_s0  ;;  %v1160_v28 = vld [vmem:[#allocation6 + $0x1c0] sm:$0xff] }
0x1319   :  { %1018 = vrot.lane.b32.xlu2 %v1291_v30, %s1501_s0  ;;  %v1159_v30 = vld [vmem:[#allocation6 + $0x1b0] sm:$0xff] }
0x1373   :  { %v1019_v31 = vpop.permute.xlu2 %1018 }
0x1374   :  { %v1021_v32 = vmul.f32 %v1019_v31, %v1012_v23 }
0x1376   :  { %1023 = vrot.lane.b32.xlu1 %v1021_v32, %s1502_s1 }
0x138a   :  { %v1065_v36 = vpop.permute.xlu0 %1064 }
0x138b   :  { %v1067_v37 = vmul.f32 %v1065_v36, %v1058_v22 }
0x138d   :  { %1069 = vrot.lane.b32.xlu2 %v1067_v37, %s1502_s1  ;;  %v1158_v37 = vld [vmem:[#allocation6 + $0x1a0] sm:$0xff] }
0x13e7   :  { %v1070_v29 = vpop.permute.xlu2 %1069 }
0x13e8   :  { %v1024_v46 = vpop.permute.xlu1 %1023  ;;  %v1072_v45 = vadd.f32 %v1070_v29, %v1062_v41  ;;  %v1157_v41 = vld [vmem:[#allocation6 + $0x190] sm:$0xff] }
0x13e9   :  { %v1792_v53 = vadd.f32 %v1024_v46, %v1016_v48  ;;  %v1156_v48 = vld [vmem:[#allocation6 + $0x105] ss:$0 sm:$0xff] }
0x13ea   :  { %1406 = vtanh.f32 %v1072_v45 }
0x13eb   :  { %1408 = vtanh.f32 %v1792_v53 }
0x13f0   :  { %v1407_v43 = vpop.eup %1406 }
0x13f1   :  { %v1409_v54 = vpop.eup %1408  ;;  %1075 = vrot.lane.b32.xlu1 %v1407_v43, %s1501_s0 }
0x13f2   :  { %1029 = vrot.lane.b32.xlu0 %v1409_v54, %s1501_s0 }
0x1463   :  { %v1076_v55 = vpop.permute.xlu1 %1075 }
0x1464   :  { %v1078_v42 = vmul.f32 %v1076_v55, %v1058_v22  ;;  %v1030_v56 = vpop.permute.xlu0 %1029  ;;  %v1164_v22 = vld [vmem:[#allocation6 + $0x200] sm:$0xff] }
0x1465   :  { %v1032_v49 = vmul.f32 %v1030_v56, %v1012_v23  ;;  %v1163_v23 = vld [vmem:[#allocation6 + $0x1f0] sm:$0xff]  ;;  %1211 = vmatpush.msra.mxu2 %v1164_v22  ;;  %v1165_v55 = vld [vmem:[#allocation6 + $0x106] ss:$0 sm:$0xff] }
0x1466   :  { %1080 = vrot.lane.b32.xlu2 %v1078_v42, %s1502_s1 }
0x1467   :  { %1083 = vrot.lane.b32.xlu0 %v1032_v49, %s1501_s0  ;;  %1212 = vmatpush.msra.mxu2 %v1163_v23 }
0x1469   :  { %1213 = vmatpush.msra.mxu2 %v1162_v24 }
0x146b   :  { %1214 = vmatpush.msra.mxu2 %v1161_v25 }
0x146d   :  { %1215 = vmatpush.msra.mxu2 %v1160_v28 }
0x146f   :  { %1216 = vmatpush.msra.mxu2 %v1159_v30 }
0x1471   :  { %1217 = vmatpush.msra.mxu2 %v1158_v37 }
0x1473   :  { %1218 = vmatpush.msra.mxu2 %v1157_v41 }
0x14c0   :  { %v1081_v44 = vpop.permute.xlu2 %1080 }
0x14d9   :  { %v1084_v13 = vpop.permute.xlu0 %1083 }
0x14da   :  { %v1086_v57 = vsel %vm117_vm6, %v1081_v44, %v1084_v13 }
0x14db   :  { %v1087_v58 = vpack.c.bf16 %v1086_v57, %v1086_v57 }
0x14dd   :  { %1294 = vmatmul.msk.bf16.vlgmr.msra.gmra.mxu1 %vm60_vm0, %v1087_v58 }
0x155a   :  { %v1100_v20 = vpop.f32.mrf.mxu1 }
0x155b   :  { %v1104_v26 = vadd.f32 %v1781_v59, %v1100_v20 }
0x155d   :  { %v1105_v60 = vmul.f32 %v1104_v26, %v1531_v50 }
0x155f   :  { %v1295_v17 = vmul.f32 -1.442695, %v1105_v60 }
0x1561   :  { %1410 = vpow2.f32 %v1295_v17 }
0x1562   :  { %v1102_v21 = vpop.f32.mrf.mxu1 }
0x1567   :  { %v1411_v61 = vpop.eup %1410 }
0x1568   :  { %v1109_v27 = vadd.f32 1.0, %v1411_v61 }
0x156a   :  { %1412 = vrcp.f32 %v1109_v27  ;;  %v1121_v63 = vand.u32 2147483648, %v1109_v27  ;;  %v1119_v51 = vand.u32 2147483647, %v1109_v27  ;;  %vm1115_vm15 = vweird.f32 %v1109_v27 }
0x156c   :  { %v1122_v39 = vor.u32 1.1754944e-38, %v1121_v63  ;;  %vm1120_vm2 = vcmp.eq.f32.partialorder %v1119_v51, 8.507059e+37 }
0x1570   :  { %v1413_v62 = vpop.eup %1412 }
0x1571   :  { %v1111_v35 = vmul.f32 %v1413_v62, %v1109_v27  ;;  %vm1116_vm14 = vweird.f32 %v1413_v62 }
0x1572   :  { %vm1117_vm1 = vmor %vm1115_vm15, %vm1116_vm14 }
0x1573   :  { %v1112_v33 = vsub.f32 1.0, %v1111_v35 }
0x1575   :  { %v1113_v0 = vmul.f32 %v1413_v62, %v1112_v33 }
0x1577   :  { %v1114_v1 = vadd.f32 %v1413_v62, %v1113_v0 }
0x1579   :  { %v1118_v59 = vsel %vm1117_vm1, %v1413_v62, %v1114_v1 }
0x157a   :  { %v1123_v50 = vsel %vm1120_vm2, %v1122_v39, %v1118_v59 }
0x157b   :  { %v1125_v2 = vmul.f32 2.0, %v1123_v50  ;;  %v1127_v7 = vmul.f32 %v1123_v50, %v1792_v53 }
0x157d   :  { %v1296_v3 = vadd.f32 -1.0, %v1125_v2 }
0x157f   :  { %1129 = vrot.lane.b32.xlu1 %v1296_v3, %s1501_s0 }
0x1587   :  { %288 = vrot.lane.b32.xlu1 %v1622_v38, %s1502_s1 }
0x158f   :  { %662 = vrot.lane.b32.xlu1 %v1720_v8, %s1502_s1 }
0x1597   :  { %1034 = vrot.lane.b32.xlu1 %v1032_v49, %s1502_s1 }
0x15f1   :  { %v1130_v4 = vpop.permute.xlu1 %1129 }
0x15f2   :  { %v1132_v5 = vmul.f32 %v1130_v4, %v1123_v50 }
0x15f4   :  { %1134 = vrot.lane.b32.xlu2 %v1132_v5, %s1502_s1 }
0x15f9   :  { %v289_v6 = vpop.permute.xlu1 %288 }
0x15fa   :  { %292 = vst.msk [vmem:[#allocation2] sm:$0x1] %vm291_vm3, %v289_v6 }
0x15fb   :  { %294 = vst.msk [vmem:[#allocation2 + $0x7] sm:$0x2] %vm293_vm4, %v289_v6 }
0x15fc   :  { %414 = vrot.lane.b32.xlu2 %v1656_v47, %s1502_s1 }
0x1601   :  { %v663_v38 = vpop.permute.xlu1 %662 }
0x1602   :  { %665 = vst.msk [vmem:[#allocation2 + $0x3] sm:$0x1] %vm291_vm3, %v663_v38 }
0x1603   :  { %666 = vst.msk [vmem:[#allocation2 + $0xa] sm:$0x2] %vm293_vm4, %v663_v38 }
0x1604   :  { %786 = vrot.lane.b32.xlu2 %v1746_v40, %s1502_s1  ;;  %v1155_v40 = vld [vmem:[#allocation6 + $0x180] sm:$0xff] }
0x1605   :  { %1184 = vmatpush.msra.mxu0 %v1155_v40  ;;  %1301 = vmatpush.msra.mxu3 %v1155_v40 }
0x1607   :  { %1185 = vmatpush.msra.mxu0 %v1154_v14  ;;  %1302 = vmatpush.msra.mxu3 %v1154_v14 }
0x1609   :  { %v1035_v8 = vpop.permute.xlu1 %1034 }
0x160a   :  { %1037 = vst.msk [vmem:[#allocation2 + $0x6] sm:$0x1] %vm291_vm3, %v1035_v8 }
0x160b   :  { %1038 = vst.msk [vmem:[#allocation2 + $0xd] sm:$0x2] %vm293_vm4, %v1035_v8 }
0x164e   :  { %v1135_v9 = vpop.permute.xlu2 %1134 }
0x164f   :  { %v1137_v10 = vadd.f32 %v1135_v9, %v1127_v7 }
0x1651   :  { %1414 = vtanh.f32 %v1137_v10 }
0x1656   :  { %v415_v11 = vpop.permute.xlu2 %414 }
0x1657   :  { %v1415_v47 = vpop.eup %1414  ;;  %417 = vst.msk [vmem:[#allocation2 + $0x1] sm:$0x1] %vm291_vm3, %v415_v11 }
0x1658   :  { %418 = vst.msk [vmem:[#allocation2 + $0x8] sm:$0x2] %vm293_vm4, %v415_v11  ;;  %1140 = vrot.lane.b32.xlu0 %v1415_v47, %s1501_s0 }
0x165e   :  { %v787_v12 = vpop.permute.xlu2 %786 }
0x165f   :  { %789 = vst.msk [vmem:[#allocation2 + $0x4] sm:$0x1] %vm291_vm3, %v787_v12 }
0x1660   :  { %790 = vst.msk [vmem:[#allocation2 + $0xb] sm:$0x2] %vm293_vm4, %v787_v12  ;;  %538 = vrot.lane.b32.xlu0 %v1690_v52, %s1502_s1  ;;  %v1153_v52 = vld [vmem:[#allocation6 + $0x160] sm:$0xff] }
0x1661   :  { %1186 = vmatpush.msra.mxu0 %v1153_v52  ;;  %1303 = vmatpush.msra.mxu3 %v1153_v52 }
0x1668   :  { %910 = vrot.lane.b32.xlu0 %v1772_v34, %s1502_s1  ;;  %v1152_v34 = vld [vmem:[#allocation6 + $0x150] sm:$0xff] }
0x1669   :  { %1187 = vmatpush.msra.mxu0 %v1152_v34  ;;  %1304 = vmatpush.msra.mxu3 %v1152_v34 }
0x16ca   :  { %v1141_v15 = vpop.permute.xlu0 %1140 }
0x16cb   :  { %v1143_v16 = vmul.f32 %v1141_v15, %v1123_v50 }
0x16cd   :  { %1145 = vrot.lane.b32.xlu2 %v1143_v16, %s1502_s1 }
0x16d2   :  { %v539_v18 = vpop.permute.xlu0 %538 }
0x16d3   :  { %541 = vst.msk [vmem:[#allocation2 + $0x2] sm:$0x1] %vm291_vm3, %v539_v18 }
0x16d4   :  { %542 = vst.msk [vmem:[#allocation2 + $0x9] sm:$0x2] %vm293_vm4, %v539_v18 }
0x16da   :  { %v911_v19 = vpop.permute.xlu0 %910 }
0x16db   :  { %913 = vst.msk [vmem:[#allocation2 + $0x5] sm:$0x1] %vm291_vm3, %v911_v19 }
0x16dc   :  { %914 = vst.msk [vmem:[#allocation2 + $0xc] sm:$0x2] %vm293_vm4, %v911_v19 }
0x1727   :  { %v1146_v31 = vpop.permute.xlu2 %1145 }
0x1728   :  { %1148 = vst.msk [vmem:[#allocation2 + $0x7] sm:$0x1] %vm291_vm3, %v1146_v31 }
0x1729   :  { %1149 = vst.msk [vmem:[#allocation2 + $0xe] sm:$0x2] %vm293_vm4, %v1146_v31 }
0x172f   :  { %v1150_v32 = vld [vmem:[#allocation2] sm:$0xff] }
0x1730   :  { %1297 = vmatmul.msk.f32.vlgmr.msra.gmra.mxu0 %vm117_vm6, %v1150_v32  ;;  %v1151_v36 = vld [vmem:[#allocation2 + $0x8] sm:$0xff] }
0x1731   :  { %1298 = vmatmul.msk.f32.vlgmr.msra.gmra.mxu3 %vm117_vm6, %v1151_v36 }
0x17ad   :  { %v1189_v29 = vpop.f32.mrf.mxu0 }
0x17ae   :  { %v1190_v46 = vadd.f32 %v1189_v29, %v1156_v48 }
0x17b0   :  { %v1195_v45 = vmax.f32 %v1190_v46, 0.0 }
0x17b2   :  { %1299 = vmatmul.msk.f32.vlgmr.msra.gmra.mxu2 %vm60_vm0, %v1195_v45 }
0x17b4   :  { %v1192_v53 = vpop.f32.mrf.mxu3 }
0x17b5   :  { %v1193_v43 = vadd.f32 %v1192_v53, %v1156_v48 }
0x17b7   :  { %v1196_v54 = vmax.f32 %v1193_v43, 0.0 }
0x17ba   :  { %1300 = vmatmul.msk.f32.gmra.mxu2 %vm60_vm0, %v1196_v54 }
0x1835   :  { %v1220_v42 = vpop.f32.mrf.mxu2 }
0x1836   :  { %v1221_v56 = vadd.f32 %v1220_v42, %v1165_v55 }
0x1838   :  { %1226 = vst [vmem:[#allocation8] sm:$0xff] %v1221_v56 }
0x183d   :  { %v1223_v49 = vpop.f32.mrf.mxu2 }
0x183e   :  { %v1224_v44 = vadd.f32 %v1223_v49, %v1165_v55 }
0x1840   :  { %1227 = vst [vmem:[#allocation8 + $0x8] sm:$0xff] %v1224_v44 }
0x1841   :  { %1240 = dma.vmem_to_hbm [thread:$0]  %s1233_s22, 256, %s1235_s25, [#allocation5], %s1504_s26, %s1504_s26, %s1505_s27  }
0x1842   :  { %1493 = dma.done.wait [#allocation5], 256  }
0x1843   :  { %1494 = vsyncadd [#allocation5], 4294967040 }
0x1844   :  { %1245 = vsyncpa [#allocation4], 1 }
0x1845   :  { %1246 = vsyncpa [#allocation7], 1 }
0x1846   :  { %1247 = vsyncpa [#allocation5], 1 }

</bundles_post_ra>
